<compile_context>
chip_gen: v7x
topology: tpu7x:2x2x1
jax: 0.10.0
libtpu: 0.0.40
codegen_flags: <defaults>
</compile_context>

<pallas_src>
import functools
import math

import jax
import jax.numpy as jnp
from jax.experimental import pallas as pl
from jax.experimental.pallas import tpu as pltpu

VOCAB = 95          # atomic numbers 0..94 (0 = padding index)
VOCAB_PAD = 128     # padded to the MXU / lane width


def _embedding_block_kernel(src_ref, tgt_ref, dist_ref,
                            emb_ref, wd_t_ref, bd_ref,
                            wj_t_ref, wi_t_ref, wdd_t_ref, b_ref,
                            o_ref, *, activation):
    tile_e = src_ref.shape[0]

    # One-hot embedding lookup on the MXU: (tile_e, 128) @ (128, H).
    lane_ids = jax.lax.broadcasted_iota(jnp.int32, (tile_e, VOCAB_PAD), 1)
    emb = emb_ref[...]                                        # (VOCAB_PAD, H)
    oh_j = (lane_ids == src_ref[...]).astype(jnp.float32)     # source atoms
    oh_i = (lane_ids == tgt_ref[...]).astype(jnp.float32)     # target atoms
    h_j = jnp.dot(oh_j, emb, preferred_element_type=jnp.float32)
    h_i = jnp.dot(oh_i, emb, preferred_element_type=jnp.float32)

    # distance_representation = Linear(num_radial -> hidden)
    d_rep = jnp.dot(dist_ref[...], wd_t_ref[...],
                    preferred_element_type=jnp.float32) + bd_ref[...]

    # Linear(3H -> H) on concat(h_j, h_i, d_rep) == sum of three HxH matmuls.
    msg = (jnp.dot(h_j, wj_t_ref[...], preferred_element_type=jnp.float32)
           + jnp.dot(h_i, wi_t_ref[...], preferred_element_type=jnp.float32)
           + jnp.dot(d_rep, wdd_t_ref[...], preferred_element_type=jnp.float32)
           + b_ref[...])
    if activation is not None:
        msg = activation(msg)
    o_ref[...] = msg.astype(o_ref.dtype)


def embedding_block(atomic_number, distance_representation, edge_index,
                    emb_weight, wd, bd, w, b, *, activation=None,
                    tile_e: int = 256):
    """Forward pass of DimeNet's EmbeddingBlock.

    atomic_number: [N] int, distance_representation: [E, R] f32,
    edge_index: [2, E] int (row 0 = source, row 1 = target),
    emb_weight: [95, H], wd: [H, R], bd: [H], w: [H, 3H], b: [H].
    Returns message embeddings [E, H].
    """
    E, R = distance_representation.shape
    H = emb_weight.shape[1]

    source, target = edge_index[0], edge_index[1]
    # Trivial per-edge int gather (atomic_number[edge_index]) done wrapper-side.
    z_src = jnp.take(atomic_number, source).astype(jnp.int32)
    z_tgt = jnp.take(atomic_number, target).astype(jnp.int32)

    # Pad E to a tile multiple; padded rows are trimmed from the output.
    n_tiles = pl.cdiv(E, tile_e)
    e_pad = n_tiles * tile_e
    pad = e_pad - E
    z_src = jnp.pad(z_src, (0, pad)).reshape(e_pad, 1)
    z_tgt = jnp.pad(z_tgt, (0, pad)).reshape(e_pad, 1)
    dist = jnp.pad(distance_representation, ((0, pad), (0, 0)))

    # Pad the embedding table vocab (95 -> 128) for the one-hot matmul.
    emb_pad = jnp.pad(emb_weight, ((0, VOCAB_PAD - emb_weight.shape[0]), (0, 0)))

    # Pre-transpose weights; split the 3H-wide linear into h_j / h_i / d parts.
    wd_t = wd.T                       # (R, H)
    w_t = w.T                         # (3H, H)
    wj_t = w_t[0:H]                   # acts on h_j
    wi_t = w_t[H:2 * H]               # acts on h_i
    wdd_t = w_t[2 * H:3 * H]          # acts on d_rep
    bd2 = bd.reshape(1, H)
    b2 = b.reshape(1, H)

    kernel = functools.partial(_embedding_block_kernel, activation=activation)
    const = lambda i: (0, 0)          # weights: resident, fetched once

    out = pl.pallas_call(
        kernel,
        out_shape=jax.ShapeDtypeStruct((e_pad, H), distance_representation.dtype),
        grid_spec=pltpu.PrefetchScalarGridSpec(
            num_scalar_prefetch=0,
            grid=(n_tiles,),
            in_specs=[
                pl.BlockSpec((tile_e, 1), lambda i: (i, 0)),    # z_src
                pl.BlockSpec((tile_e, 1), lambda i: (i, 0)),    # z_tgt
                pl.BlockSpec((tile_e, R), lambda i: (i, 0)),    # rbf tile
                pl.BlockSpec((VOCAB_PAD, H), const),            # embedding table
                pl.BlockSpec((R, H), const),                    # Wd^T
                pl.BlockSpec((1, H), const),                    # bd
                pl.BlockSpec((H, H), const),                    # Wj^T
                pl.BlockSpec((H, H), const),                    # Wi^T
                pl.BlockSpec((H, H), const),                    # Wdd^T
                pl.BlockSpec((1, H), const),                    # b
            ],
            out_specs=pl.BlockSpec((tile_e, H), lambda i: (i, 0)),
        ),
        compiler_params=pltpu.CompilerParams(
            dimension_semantics=("parallel",)),
    )(z_src, z_tgt, dist, emb_pad, wd_t, bd2, wj_t, wi_t, wdd_t, b2)

    return out[:E]


def embedding_block_ref(atomic_number, distance_representation, edge_index,
                        emb_weight, wd, bd, w, b, activation=None):
    """Plain-JAX reference mirroring the PyTorch module."""
    hp = jax.lax.Precision.HIGHEST
    d_rep = jnp.dot(distance_representation, wd.T, precision=hp) + bd
    source, target = edge_index[0], edge_index[1]
    h_i = emb_weight[atomic_number[target]]
    h_j = emb_weight[atomic_number[source]]
    m = jnp.concatenate([h_j, h_i, d_rep], axis=-1)
    m = jnp.dot(m, w.T, precision=hp) + b
    if activation is not None:
        m = activation(m)
    return m


if __name__ == "__main__":
    num_radial_basis = 8
    hidden_dim = 128           # = lane width -> lane-dense output stores
    num_atoms = 32
    num_edges = 500            # deliberately not a multiple of tile_e

    key = jax.random.PRNGKey(0)
    (k_emb, k_wd, k_bd, k_w, k_b,
     k_z, k_src, k_tgt, k_d) = jax.random.split(key, 9)

    # Parameters (init scheme does not change forward semantics; uniform /
    # scaled-normal stand in for torch's uniform / orthogonal inits).
    emb_weight = jax.random.uniform(k_emb, (VOCAB, hidden_dim), jnp.float32,
                                    minval=-math.sqrt(3.0),
                                    maxval=math.sqrt(3.0))
    emb_weight = emb_weight.at[0].set(0.0)       # padding_idx = 0
    wd = jax.random.normal(k_wd, (hidden_dim, num_radial_basis),
                           jnp.float32) / math.sqrt(num_radial_basis)
    bd = jax.random.normal(k_bd, (hidden_dim,), jnp.float32) * 0.1
    w = jax.random.normal(k_w, (hidden_dim, 3 * hidden_dim),
                          jnp.float32) / math.sqrt(3 * hidden_dim)
    b = jax.random.normal(k_b, (hidden_dim,), jnp.float32) * 0.1

    # Inputs.
    atomic_number = jax.random.randint(k_z, (num_atoms,), 1, VOCAB, jnp.int32)
    edge_index = jnp.stack([
        jax.random.randint(k_src, (num_edges,), 0, num_atoms, jnp.int32),
        jax.random.randint(k_tgt, (num_edges,), 0, num_atoms, jnp.int32)])
    distance_representation = jax.random.uniform(
        k_d, (num_edges, num_radial_basis), dtype=jnp.float32)

    out = embedding_block(atomic_number, distance_representation, edge_index,
                          emb_weight, wd, bd, w, b,
                          activation=None, tile_e=256)
    out = jax.block_until_ready(out)

    ref = embedding_block_ref(atomic_number, distance_representation,
                              edge_index, emb_weight, wd, bd, w, b)
    assert out.shape == (num_edges, hidden_dim)
    assert jnp.allclose(out, ref, atol=2e-3, rtol=2e-3), \
        float(jnp.max(jnp.abs(out - ref)))

    print("KERNEL_OK")
</pallas_src>

<mosaic_0001>
module attributes {stable_mosaic.version = 11 : i64} {
  func.func @_embedding_block_kernel(%arg0: i32, %arg1: memref<256x1xi32, #tpu.memory_space<vmem>>, %arg2: memref<256x1xi32, #tpu.memory_space<vmem>>, %arg3: memref<256x8xf32, #tpu.memory_space<vmem>>, %arg4: memref<128x128xf32, #tpu.memory_space<vmem>>, %arg5: memref<8x128xf32, #tpu.memory_space<vmem>>, %arg6: memref<1x128xf32, #tpu.memory_space<vmem>>, %arg7: memref<128x128xf32, #tpu.memory_space<vmem>>, %arg8: memref<128x128xf32, #tpu.memory_space<vmem>>, %arg9: memref<128x128xf32, #tpu.memory_space<vmem>>, %arg10: memref<1x128xf32, #tpu.memory_space<vmem>>, %arg11: memref<256x128xf32, #tpu.memory_space<vmem>>) attributes {dimension_semantics = [#tpu.dimension_semantics<parallel>], iteration_bounds = array<i64: 2>, scalar_prefetch = 0 : i64, scratch_operands = 0 : i64, tpu.core_type = #tpu.core_type<tc>, window_params = [{transform_indices = @transform_0, window_bounds = array<i64: 256, 1>}, {transform_indices = @transform_1, window_bounds = array<i64: 256, 1>}, {transform_indices = @transform_2, window_bounds = array<i64: 256, 8>}, {pipeline_mode = #tpu.pipeline_mode<synchronous>, transform_indices = @transform_3, window_bounds = array<i64: 128, 128>}, {pipeline_mode = #tpu.pipeline_mode<synchronous>, transform_indices = @transform_4, window_bounds = array<i64: 8, 128>}, {pipeline_mode = #tpu.pipeline_mode<synchronous>, transform_indices = @transform_5, window_bounds = array<i64: 1, 128>}, {pipeline_mode = #tpu.pipeline_mode<synchronous>, transform_indices = @transform_6, window_bounds = array<i64: 128, 128>}, {pipeline_mode = #tpu.pipeline_mode<synchronous>, transform_indices = @transform_7, window_bounds = array<i64: 128, 128>}, {pipeline_mode = #tpu.pipeline_mode<synchronous>, transform_indices = @transform_8, window_bounds = array<i64: 128, 128>}, {pipeline_mode = #tpu.pipeline_mode<synchronous>, transform_indices = @transform_9, window_bounds = array<i64: 1, 128>}, {transform_indices = @transform_10, window_bounds = array<i64: 256, 128>}]} {
    %0 = tpu.iota {dimensions = array<i32: 1>} : vector<256x128xi32>
    %c0 = arith.constant 0 : index
    %c0_0 = arith.constant 0 : index
    %1 = vector.load %arg4[%c0, %c0_0] : memref<128x128xf32, #tpu.memory_space<vmem>>, vector<128x128xf32>
    %c0_1 = arith.constant 0 : index
    %c0_2 = arith.constant 0 : index
    %2 = vector.load %arg1[%c0_1, %c0_2] : memref<256x1xi32, #tpu.memory_space<vmem>>, vector<256x1xi32>
    %3 = vector.broadcast %2 : vector<256x1xi32> to vector<256x128xi32>
    %4 = arith.cmpi eq, %0, %3 : vector<256x128xi32>
    %5 = arith.extui %4 : vector<256x128xi1> to vector<256x128xi32>
    %6 = arith.sitofp %5 : vector<256x128xi32> to vector<256x128xf32>
    %c0_3 = arith.constant 0 : index
    %c0_4 = arith.constant 0 : index
    %7 = vector.load %arg2[%c0_3, %c0_4] : memref<256x1xi32, #tpu.memory_space<vmem>>, vector<256x1xi32>
    %8 = vector.broadcast %7 : vector<256x1xi32> to vector<256x128xi32>
    %9 = arith.cmpi eq, %0, %8 : vector<256x128xi32>
    %10 = arith.extui %9 : vector<256x128xi1> to vector<256x128xi32>
    %11 = arith.sitofp %10 : vector<256x128xi32> to vector<256x128xf32>
    %cst = arith.constant dense<0.000000e+00> : vector<256x128xf32>
    %12 = tpu.matmul %6, %1, %cst {dimension_numbers = #tpu.dot_dimension_numbers<[1], [0], [0], [1], [0, 0, 1, 1], [], []>} : vector<256x128xf32>, vector<128x128xf32>, vector<256x128xf32> -> vector<256x128xf32>
    %cst_5 = arith.constant dense<0.000000e+00> : vector<256x128xf32>
    %13 = tpu.matmul %11, %1, %cst_5 {dimension_numbers = #tpu.dot_dimension_numbers<[1], [0], [0], [1], [0, 0, 1, 1], [], []>} : vector<256x128xf32>, vector<128x128xf32>, vector<256x128xf32> -> vector<256x128xf32>
    %c0_6 = arith.constant 0 : index
    %c0_7 = arith.constant 0 : index
    %14 = vector.load %arg3[%c0_6, %c0_7] : memref<256x8xf32, #tpu.memory_space<vmem>>, vector<256x8xf32>
    %c0_8 = arith.constant 0 : index
    %c0_9 = arith.constant 0 : index
    %15 = vector.load %arg5[%c0_8, %c0_9] : memref<8x128xf32, #tpu.memory_space<vmem>>, vector<8x128xf32>
    %cst_10 = arith.constant dense<0.000000e+00> : vector<256x128xf32>
    %16 = tpu.matmul %14, %15, %cst_10 {dimension_numbers = #tpu.dot_dimension_numbers<[1], [0], [0], [1], [0, 0, 1, 1], [], []>} : vector<256x8xf32>, vector<8x128xf32>, vector<256x128xf32> -> vector<256x128xf32>
    %c0_11 = arith.constant 0 : index
    %c0_12 = arith.constant 0 : index
    %17 = vector.load %arg6[%c0_11, %c0_12] : memref<1x128xf32, #tpu.memory_space<vmem>>, vector<1x128xf32>
    %18 = vector.broadcast %17 : vector<1x128xf32> to vector<256x128xf32>
    %19 = arith.addf %16, %18 : vector<256x128xf32>
    %c0_13 = arith.constant 0 : index
    %c0_14 = arith.constant 0 : index
    %20 = vector.load %arg7[%c0_13, %c0_14] : memref<128x128xf32, #tpu.memory_space<vmem>>, vector<128x128xf32>
    %cst_15 = arith.constant dense<0.000000e+00> : vector<256x128xf32>
    %21 = tpu.matmul %12, %20, %cst_15 {dimension_numbers = #tpu.dot_dimension_numbers<[1], [0], [0], [1], [0, 0, 1, 1], [], []>} : vector<256x128xf32>, vector<128x128xf32>, vector<256x128xf32> -> vector<256x128xf32>
    %c0_16 = arith.constant 0 : index
    %c0_17 = arith.constant 0 : index
    %22 = vector.load %arg8[%c0_16, %c0_17] : memref<128x128xf32, #tpu.memory_space<vmem>>, vector<128x128xf32>
    %cst_18 = arith.constant dense<0.000000e+00> : vector<256x128xf32>
    %23 = tpu.matmul %13, %22, %cst_18 {dimension_numbers = #tpu.dot_dimension_numbers<[1], [0], [0], [1], [0, 0, 1, 1], [], []>} : vector<256x128xf32>, vector<128x128xf32>, vector<256x128xf32> -> vector<256x128xf32>
    %24 = arith.addf %21, %23 : vector<256x128xf32>
    %c0_19 = arith.constant 0 : index
    %c0_20 = arith.constant 0 : index
    %25 = vector.load %arg9[%c0_19, %c0_20] : memref<128x128xf32, #tpu.memory_space<vmem>>, vector<128x128xf32>
    %cst_21 = arith.constant dense<0.000000e+00> : vector<256x128xf32>
    %26 = tpu.matmul %19, %25, %cst_21 {dimension_numbers = #tpu.dot_dimension_numbers<[1], [0], [0], [1], [0, 0, 1, 1], [], []>} : vector<256x128xf32>, vector<128x128xf32>, vector<256x128xf32> -> vector<256x128xf32>
    %27 = arith.addf %24, %26 : vector<256x128xf32>
    %c0_22 = arith.constant 0 : index
    %c0_23 = arith.constant 0 : index
    %28 = vector.load %arg10[%c0_22, %c0_23] : memref<1x128xf32, #tpu.memory_space<vmem>>, vector<1x128xf32>
    %29 = vector.broadcast %28 : vector<1x128xf32> to vector<256x128xf32>
    %30 = arith.addf %27, %29 : vector<256x128xf32>
    %c0_24 = arith.constant 0 : index
    %c0_25 = arith.constant 0 : index
    %31 = vector.load %arg11[%c0_24, %c0_25] : memref<256x128xf32, #tpu.memory_space<vmem>>, vector<256x128xf32>
    tpu.vector_store %arg11[%c0_24, %c0_25], %30 {strides = array<i32>} : memref<256x128xf32, #tpu.memory_space<vmem>>, vector<256x128xf32>,
    return
  }
  func.func @transform_0(%arg0: i32) -> (i32, i32) {
    %c0_i32 = arith.constant 0 : i32
    %c0_i32_0 = arith.constant 0 : i32
    return %arg0, %c0_i32 : i32, i32
  }
  func.func @transform_1(%arg0: i32) -> (i32, i32) {
    %c0_i32 = arith.constant 0 : i32
    %c0_i32_0 = arith.constant 0 : i32
    return %arg0, %c0_i32 : i32, i32
  }
  func.func @transform_2(%arg0: i32) -> (i32, i32) {
    %c0_i32 = arith.constant 0 : i32
    %c0_i32_0 = arith.constant 0 : i32
    return %arg0, %c0_i32 : i32, i32
  }
  func.func @transform_3(%arg0: i32) -> (i32, i32) {
    %c0_i32 = arith.constant 0 : i32
    %c0_i32_0 = arith.constant 0 : i32
    %c0_i32_1 = arith.constant 0 : i32
    return %c0_i32, %c0_i32_0 : i32, i32
  }
  func.func @transform_4(%arg0: i32) -> (i32, i32) {
    %c0_i32 = arith.constant 0 : i32
    %c0_i32_0 = arith.constant 0 : i32
    %c0_i32_1 = arith.constant 0 : i32
    return %c0_i32, %c0_i32_0 : i32, i32
  }
  func.func @transform_5(%arg0: i32) -> (i32, i32) {
    %c0_i32 = arith.constant 0 : i32
    %c0_i32_0 = arith.constant 0 : i32
    %c0_i32_1 = arith.constant 0 : i32
    return %c0_i32, %c0_i32_0 : i32, i32
  }
  func.func @transform_6(%arg0: i32) -> (i32, i32) {
    %c0_i32 = arith.constant 0 : i32
    %c0_i32_0 = arith.constant 0 : i32
    %c0_i32_1 = arith.constant 0 : i32
    return %c0_i32, %c0_i32_0 : i32, i32
  }
  func.func @transform_7(%arg0: i32) -> (i32, i32) {
    %c0_i32 = arith.constant 0 : i32
    %c0_i32_0 = arith.constant 0 : i32
    %c0_i32_1 = arith.constant 0 : i32
    return %c0_i32, %c0_i32_0 : i32, i32
  }
  func.func @transform_8(%arg0: i32) -> (i32, i32) {
    %c0_i32 = arith.constant 0 : i32
    %c0_i32_0 = arith.constant 0 : i32
    %c0_i32_1 = arith.constant 0 : i32
    return %c0_i32, %c0_i32_0 : i32, i32
  }
  func.func @transform_9(%arg0: i32) -> (i32, i32) {
    %c0_i32 = arith.constant 0 : i32
    %c0_i32_0 = arith.constant 0 : i32
    %c0_i32_1 = arith.constant 0 : i32
    return %c0_i32, %c0_i32_0 : i32, i32
  }
  func.func @transform_10(%arg0: i32) -> (i32, i32) {
    %c0_i32 = arith.constant 0 : i32
    %c0_i32_0 = arith.constant 0 : i32
    return %arg0, %c0_i32 : i32, i32
  }
}

</mosaic_0001>

<bundles_post_ra>
// kernel: tpu_custom_call.1
= control target key start
LH: loop header
LB: loop body
LE: loop exit
PB: predicated region body
PF: predicated region fallthrough
CT: control target
= control target key end

     0   :  { %15 = vsyncpa [#allocation3], 0  ;;  %s4806_s0 = inlined_call_operand.vmem [shape: s32[512,1], index: 0, kind: input, shape index: {}]   ;;  %s4807_s1 = inlined_call_operand.vmem [shape: s32[512,1], index: 1, kind: input, shape index: {}]   ;;  %s4808_s2 = inlined_call_operand.vmem [shape: f32[512,8], index: 2, kind: input, shape index: {}]   ;;  %s4809_s3 = inlined_call_operand.vmem [shape: f32[128,128], index: 3, kind: input, shape index: {}]   ;;  %s4810_s4 = inlined_call_operand.vmem [shape: f32[8,128], index: 4, kind: input, shape index: {}]   ;;  %s4811_s5 = inlined_call_operand.vmem [shape: f32[1,128], index: 5, kind: input, shape index: {}]   ;;  %s4812_s6 = inlined_call_operand.vmem [shape: f32[128,128], index: 6, kind: input, shape index: {}]   ;;  %s4813_s7 = inlined_call_operand.vmem [shape: f32[128,128], index: 7, kind: input, shape index: {}]   ;;  %s4814_s8 = inlined_call_operand.vmem [shape: f32[128,128], index: 8, kind: input, shape index: {}]   ;;  %s4815_s9 = inlined_call_operand.vmem [shape: f32[1,128], index: 9, kind: input, shape index: {}]   ;;  %s4816_s10 = inlined_call_operand.hbm [shape: f32[512,128], index: 10, kind: output, shape index: {}]  }
   0x1   :  { %17 = vsyncpa [#allocation3 + $0x1], 0  ;;  %s3904_s13 = smov 0   ;;  %s3906_s14 = smov 0  }
   0x2   :  { %s3908_s15 = smov 0   ;;  %s3910_s16 = smov 0  }
   0x3 LB: > { %s3925_s17 = sadd.s32 4294967295, %s3842_s16   ;;  %s2609_s18 = sadd.s32 4294967294, %s3842_s16   ;;  %s3842_s16 = sphi %s3910_s16, %s4822_s16   ;;  %s3838_s15 = sphi %s3908_s15, %s4821_s15   ;;  %s3834_s14 = sphi %s3906_s14, %s4820_s14   ;;  %s3830_s13 = sphi %s3904_s13, %s4819_s13  }
   0x4   : > { %s3929_s19 = sadd.s32 1, %s3842_s16   ;;  %s255_s20 = sadd.s32 1, %s3838_s15 }
   0x5   : > { %s252_s21 = ssub.s32 %s3842_s16, %s3929_s19  ;;  %p265_p0 = scmp.ne.s32.totalorder %s3838_s15, %s3834_s14 }
   0x6   : > { %p253_p1 = scmp.eq.s32.totalorder %s252_s21, 0  ;;  %p266_p2 = scmp.eq.s32.totalorder %s3925_s17, 1 }
   0x7   : > { %p271_p3 = scmp.ne.s32.totalorder %s3834_s14, %s3830_s13  ;;  %p272_p4 = scmp.eq.s32.totalorder %s2609_s18, 1 }
   0x8   : > { %s3940_s22 = scalar_select %p253_p1, %s3838_s15, %s255_s20  }
   0x9   : > { %p3942_p5 = por %p266_p2, %p265_p0  ;;  %p3946_p6 = por %p272_p4, %p271_p3 }
   0xa   : > { %p2612_p7 = scmp.ge.s32.totalorder %s3842_s16, 1  ;;  %p338_p8 = scmp.lt.s32.totalorder %s3842_s16, 3 }
   0xc   : > { %p339_p9 = pnand %p2612_p7, %p338_p8 }
   0xd   : > { %s2614_s25 = sshll.u32 (!%p339_p9), %s3925_s17, 5  ;;  %v407_v0 = vld [vmem:[%s4809_s3] sm:$0xff] (!%p339_p9)  ;;  %v408_v1 = vld [vmem:[%s4809_s3 + $0x8] sm:$0xff] (!%p339_p9)  ;;  %v409_v2 = vld [vmem:[%s4809_s3 + $0x10] sm:$0xff] (!%p339_p9)  ;;  %v3844_v3 = vmov (!%p339_p9), 0   ;;  %s383_s18 = sand.u32 (!%p339_p9), 1, %s3834_s14  }
   0xe   : > { %342 = sbr.rel (%p339_p9) target bundleno = 854 (0x356), region = 60  ;;  %3779 = vset.pattern.permute.xlu1 (!%p339_p9), %v3844_v3  ;;  %3778 = vset.pattern.permute.xlu0 (!%p339_p9), %v3844_v3  ;;  %p387_p10 = scmp.lt.s32.totalorder (!%p339_p9), %s2614_s25, 63  ;;  %v3962_v4 = vpack.c.bf16 (!%p339_p9), %v408_v1, %v407_v0  ;;  %v410_v5 = vld [vmem:[%s4809_s3 + $0x18] sm:$0xff] (!%p339_p9)  ;;  %v411_v7 = vld [vmem:[%s4809_s3 + $0x20] sm:$0xff] (!%p339_p9)  ;;  %v412_v8 = vld [vmem:[%s4809_s3 + $0x28] sm:$0xff] (!%p339_p9) }
   0xf   : > { %v3967_v6 = vpack.c.bf16 (!%p339_p9), %v410_v5, %v409_v2  ;;  %v3986_v9 = vpack.c.bf16 (!%p339_p9), %v412_v8, %v411_v7  ;;  %v413_v10 = vld [vmem:[%s4809_s3 + $0x30] sm:$0xff] (!%p339_p9)  ;;  %v414_v13 = vld [vmem:[%s4809_s3 + $0x38] sm:$0xff] (!%p339_p9)  ;;  %v415_v17 = vld [vmem:[%s4809_s3 + $0x40] sm:$0xff] (!%p339_p9)  ;;  %s2787_s26 = sshll.u32 (!%p339_p9), %s3925_s17, 12  ;;  %s4765_s17 = scalar_lea.sflag (!%p339_p9), [#allocation3], %s383_s18 }
  0x10   : > { %3512 = vmatprep.subr.bf16.mxu0 (!%p339_p9), %v3962_v4  ;;  %v4000_v16 = vpack.c.bf16 (!%p339_p9), %v414_v13, %v413_v10  ;;  %v416_v18 = vld [vmem:[%s4809_s3 + $0x48] sm:$0xff] (!%p339_p9)  ;;  %v417_v22 = vld [vmem:[%s4809_s3 + $0x50] sm:$0xff] (!%p339_p9)  ;;  %v418_v23 = vld [vmem:[%s4809_s3 + $0x58] sm:$0xff] (!%p339_p9)  ;;  %s4756_s30 = scalar_lea.hbm (!%p339_p9), %s4816_s10, %s2787_s26 }
  0x11   : > { %3514 = vmatpush3.bf16.msra.mxu0 (!%p339_p9), %v3962_v4  ;;  %v4012_v21 = vpack.c.bf16 (!%p339_p9), %v416_v18, %v415_v17  ;;  %v4024_v26 = vpack.c.bf16 (!%p339_p9), %v418_v23, %v417_v22  ;;  %v419_v27 = vld [vmem:[%s4809_s3 + $0x60] sm:$0xff] (!%p339_p9)  ;;  %v420_v28 = vld [vmem:[%s4809_s3 + $0x68] sm:$0xff] (!%p339_p9)  ;;  %v421_v32 = vld [vmem:[%s4809_s3 + $0x70] sm:$0xff] (!%p339_p9) }
  0x12   : > { %3516 = vmatprep.subr.bf16.mxu0 (!%p339_p9), %v3967_v6  ;;  %v4036_v31 = vpack.c.bf16 (!%p339_p9), %v420_v28, %v419_v27  ;;  %v422_v33 = vld [vmem:[%s4809_s3 + $0x78] sm:$0xff] (!%p339_p9) }
  0x13   : > { %v4048_v36 = vpack.c.bf16 (!%p339_p9), %v422_v33, %v421_v32 }
  0x15   : > { %s4824_s25 = smov (!%p387_p10, %s2614_s25), 63  ;;  %3518 = vmatpush3.bf16.msra.mxu0 %v3967_v6 }
  0x16   : > { %s3977_s28 = sshll.u32 %s4824_s25, 3  ;;  %3520 = vmatprep.subr.bf16.mxu0 %v3986_v9  ;;  %s2613_s25 = sshll.u32 %s383_s18, 8 }
  0x17   : > { %s3984_s11 = scalar_lea.vmem %s4806_s0, %s3977_s28  ;;  %s4078_s21 = scalar_lea.vmem %s4807_s1, %s3977_s28 }
  0x18   : > { %v425_v11 = vld [vmem:[%s3984_s11 + $0x10] sm:$0xff]  ;;  %v423_v12 = vld [vmem:[%s3984_s11] sm:$0xff]  ;;  %v426_v14 = vld [vmem:[%s3984_s11 + $0x18] sm:$0xff]  ;;  %s4266_s20 = scalar_lea.vmem %s4808_s2, %s3977_s28 }
  0x19   : > { %462 = vperm.xlu1 %3779, %v425_v11   ;;  %456 = vperm.xlu0 %3778, %v423_v12   ;;  %v424_v15 = vld [vmem:[%s3984_s11 + $0x8] sm:$0xff]  ;;  %v427_v20 = vld [vmem:[%s3984_s11 + $0x20] sm:$0xff]  ;;  %v430_v24 = vld [vmem:[%s3984_s11 + $0x38] sm:$0xff] }
  0x1a   : > { %v428_v19 = vld [vmem:[%s3984_s11 + $0x28] sm:$0xff]  ;;  %3522 = vmatpush3.bf16.msra.mxu0 %v3986_v9  ;;  %v429_v25 = vld [vmem:[%s3984_s11 + $0x30] sm:$0xff]  ;;  %v431_v30 = vld [vmem:[%s3984_s11 + $0x40] sm:$0xff] }
  0x1b   : > { %3524 = vmatprep.subr.bf16.mxu0 %v4000_v16  ;;  %v432_v29 = vld [vmem:[%s3984_s11 + $0x48] sm:$0xff]  ;;  %v434_v34 = vld [vmem:[%s3984_s11 + $0x58] sm:$0xff]  ;;  %v433_v35 = vld [vmem:[%s3984_s11 + $0x50] sm:$0xff] }
  0x1c   : > { %v436_v37 = vld [vmem:[%s3984_s11 + $0x68] sm:$0xff]  ;;  %v435_v38 = vld [vmem:[%s3984_s11 + $0x60] sm:$0xff]  ;;  %v438_v39 = vld [vmem:[%s3984_s11 + $0x78] sm:$0xff] }
  0x1d   : > { %465 = vperm.xlu1 %3779, %v426_v14   ;;  %459 = vperm.xlu0 %3778, %v424_v15   ;;  %v437_v40 = vld [vmem:[%s3984_s11 + $0x70] sm:$0xff]  ;;  %v440_v41 = vld [vmem:[%s3984_s11 + $0x88] sm:$0xff]  ;;  %v439_v42 = vld [vmem:[%s3984_s11 + $0x80] sm:$0xff] }
  0x1e   : > { %3526 = vmatpush3.bf16.msra.mxu0 %v4000_v16  ;;  %v442_v43 = vld [vmem:[%s3984_s11 + $0x98] sm:$0xff]  ;;  %v441_v44 = vld [vmem:[%s3984_s11 + $0x90] sm:$0xff]  ;;  %v444_v45 = vld [vmem:[%s3984_s11 + $0xa8] sm:$0xff] }
  0x1f   : > { %3528 = vmatprep.subr.bf16.mxu0 %v4012_v21  ;;  %v443_v46 = vld [vmem:[%s3984_s11 + $0xa0] sm:$0xff]  ;;  %v446_v47 = vld [vmem:[%s3984_s11 + $0xb8] sm:$0xff]  ;;  %v445_v48 = vld [vmem:[%s3984_s11 + $0xb0] sm:$0xff] }
  0x20   : > { %v448_v49 = vld [vmem:[%s3984_s11 + $0xc8] sm:$0xff]  ;;  %v447_v50 = vld [vmem:[%s3984_s11 + $0xc0] sm:$0xff]  ;;  %v450_v51 = vld [vmem:[%s3984_s11 + $0xd8] sm:$0xff] }
  0x21   : > { %471 = vperm.xlu1 %3779, %v428_v19   ;;  %468 = vperm.xlu0 %3778, %v427_v20   ;;  %v449_v52 = vld [vmem:[%s3984_s11 + $0xd0] sm:$0xff]  ;;  %v452_v53 = vld [vmem:[%s3984_s11 + $0xe8] sm:$0xff]  ;;  %v451_v54 = vld [vmem:[%s3984_s11 + $0xe0] sm:$0xff] }
  0x22   : > { %3530 = vmatpush3.bf16.msra.mxu0 %v4012_v21  ;;  %v454_v55 = vld [vmem:[%s3984_s11 + $0xf8] sm:$0xff]  ;;  %v453_v56 = vld [vmem:[%s3984_s11 + $0xf0] sm:$0xff]  ;;  %v648_v57 = vld [vmem:[%s4078_s21 + $0x8] sm:$0xff] }
  0x23   : > { %3532 = vmatprep.subr.bf16.mxu0 %v4024_v26  ;;  %v647_v58 = vld [vmem:[%s4078_s21] sm:$0xff]  ;;  %v650_v59 = vld [vmem:[%s4078_s21 + $0x18] sm:$0xff]  ;;  %v649_v60 = vld [vmem:[%s4078_s21 + $0x10] sm:$0xff] }
  0x24   : > { %v652_v61 = vld [vmem:[%s4078_s21 + $0x28] sm:$0xff]  ;;  %v651_v62 = vld [vmem:[%s4078_s21 + $0x20] sm:$0xff]  ;;  %v654_v63 = vld [vmem:[%s4078_s21 + $0x38] sm:$0xff] }
  0x25   : > { %477 = vperm.xlu1 %3779, %v430_v24   ;;  %474 = vperm.xlu0 %3778, %v429_v25   ;;  %v653_v0 = vld [vmem:[%s4078_s21 + $0x30] sm:$0xff]  ;;  %v656_v1 = vld [vmem:[%s4078_s21 + $0x48] sm:$0xff]  ;;  %v655_v2 = vld [vmem:[%s4078_s21 + $0x40] sm:$0xff] }
  0x26   : > { %3534 = vmatpush3.bf16.msra.mxu0 %v4024_v26  ;;  %v658_v3 = vld [vmem:[%s4078_s21 + $0x58] sm:$0xff]  ;;  %v657_v5 = vld [vmem:[%s4078_s21 + $0x50] sm:$0xff]  ;;  %v660_v7 = vld [vmem:[%s4078_s21 + $0x68] sm:$0xff] }
  0x27   : > { %3536 = vmatprep.subr.bf16.mxu0 %v4036_v31  ;;  %v659_v8 = vld [vmem:[%s4078_s21 + $0x60] sm:$0xff]  ;;  %v662_v10 = vld [vmem:[%s4078_s21 + $0x78] sm:$0xff]  ;;  %v661_v11 = vld [vmem:[%s4078_s21 + $0x70] sm:$0xff] }
  0x28   : > { %v664_v12 = vld [vmem:[%s4078_s21 + $0x88] sm:$0xff]  ;;  %v663_v13 = vld [vmem:[%s4078_s21 + $0x80] sm:$0xff]  ;;  %v666_v14 = vld [vmem:[%s4078_s21 + $0x98] sm:$0xff] }
  0x29   : > { %483 = vperm.xlu1 %3779, %v432_v29   ;;  %480 = vperm.xlu0 %3778, %v431_v30   ;;  %v665_v15 = vld [vmem:[%s4078_s21 + $0x90] sm:$0xff]  ;;  %v668_v17 = vld [vmem:[%s4078_s21 + $0xa8] sm:$0xff]  ;;  %v667_v18 = vld [vmem:[%s4078_s21 + $0xa0] sm:$0xff]  ;;  %v405_v29 = vlaneseq }
  0x2a   : > { %3538 = vmatpush3.bf16.msra.mxu0 %v4036_v31  ;;  %v670_v19 = vld [vmem:[%s4078_s21 + $0xb8] sm:$0xff]  ;;  %v669_v20 = vld [vmem:[%s4078_s21 + $0xb0] sm:$0xff]  ;;  %v672_v22 = vld [vmem:[%s4078_s21 + $0xc8] sm:$0xff] }
  0x2b   : > { %3540 = vmatprep.subr.bf16.mxu0 %v4048_v36  ;;  %v671_v23 = vld [vmem:[%s4078_s21 + $0xc0] sm:$0xff]  ;;  %v674_v24 = vld [vmem:[%s4078_s21 + $0xd8] sm:$0xff]  ;;  %v673_v25 = vld [vmem:[%s4078_s21 + $0xd0] sm:$0xff]  ;;  %v4112_v33 = vand.u32 127, %v405_v29 }
  0x2c   : > { %v676_v27 = vld [vmem:[%s4078_s21 + $0xe8] sm:$0xff]  ;;  %v675_v28 = vld [vmem:[%s4078_s21 + $0xe0] sm:$0xff]  ;;  %v678_v30 = vld [vmem:[%s4078_s21 + $0xf8] sm:$0xff] }
  0x2d   : > { %489 = vperm.xlu1 %3779, %v434_v34   ;;  %486 = vperm.xlu0 %3778, %v433_v35   ;;  %v677_v32 = vld [vmem:[%s4078_s21 + $0xf0] sm:$0xff] }
  0x2e   : > { %3542 = vmatpush3.bf16.msra.mxu0 %v4048_v36 }
  0x2f   : > { %3544 = vmatprep.subr.bf16.mxu0 %v3962_v4 }
  0x31   : > { %495 = vperm.xlu1 %3779, %v436_v37   ;;  %492 = vperm.xlu0 %3778, %v435_v38   ;;  %v3845_v37 = vmov 1.0  }
  0x35   : > { %501 = vperm.xlu1 %3779, %v438_v39   ;;  %498 = vperm.xlu0 %3778, %v437_v40  }
  0x39   : > { %507 = vperm.xlu1 %3779, %v440_v41   ;;  %504 = vperm.xlu0 %3778, %v439_v42  }
  0x3d   : > { %513 = vperm.xlu1 %3779, %v442_v43   ;;  %510 = vperm.xlu0 %3778, %v441_v44  }
  0x41   : > { %519 = vperm.xlu1 %3779, %v444_v45   ;;  %516 = vperm.xlu0 %3778, %v443_v46  }
  0x45   : > { %525 = vperm.xlu1 %3779, %v446_v47   ;;  %522 = vperm.xlu0 %3778, %v445_v48  }
  0x49   : > { %531 = vperm.xlu1 %3779, %v448_v49   ;;  %528 = vperm.xlu0 %3778, %v447_v50  }
  0x4d   : > { %537 = vperm.xlu1 %3779, %v450_v51   ;;  %534 = vperm.xlu0 %3778, %v449_v52  }
  0x51   : > { %543 = vperm.xlu1 %3779, %v452_v53   ;;  %540 = vperm.xlu0 %3778, %v451_v54  }
  0x55   : > { %549 = vperm.xlu1 %3779, %v454_v55   ;;  %546 = vperm.xlu0 %3778, %v453_v56  }
  0x59   : > { %683 = vperm.xlu1 %3779, %v648_v57   ;;  %680 = vperm.xlu0 %3778, %v647_v58  }
  0x5d   : > { %689 = vperm.xlu1 %3779, %v650_v59   ;;  %686 = vperm.xlu0 %3778, %v649_v60  }
  0x61   : > { %695 = vperm.xlu1 %3779, %v652_v61   ;;  %692 = vperm.xlu0 %3778, %v651_v62  }
  0x65   : > { %701 = vperm.xlu1 %3779, %v654_v63   ;;  %698 = vperm.xlu0 %3778, %v653_v0  }
  0x69   : > { %707 = vperm.xlu1 %3779, %v656_v1   ;;  %704 = vperm.xlu0 %3778, %v655_v2  }
  0x6d   : > { %713 = vperm.xlu1 %3779, %v658_v3   ;;  %710 = vperm.xlu0 %3778, %v657_v5  }
  0x71   : > { %719 = vperm.xlu1 %3779, %v660_v7   ;;  %716 = vperm.xlu0 %3778, %v659_v8  }
  0x75   : > { %725 = vperm.xlu1 %3779, %v662_v10   ;;  %722 = vperm.xlu0 %3778, %v661_v11  }
  0x79   : > { %731 = vperm.xlu1 %3779, %v664_v12   ;;  %728 = vperm.xlu0 %3778, %v663_v13  }
  0x7d   : > { %737 = vperm.xlu1 %3779, %v666_v14   ;;  %734 = vperm.xlu0 %3778, %v665_v15  }
  0x81   : > { %743 = vperm.xlu1 %3779, %v668_v17   ;;  %740 = vperm.xlu0 %3778, %v667_v18  }
  0x85   : > { %749 = vperm.xlu1 %3779, %v670_v19   ;;  %746 = vperm.xlu0 %3778, %v669_v20  }
  0x89   : > { %755 = vperm.xlu1 %3779, %v672_v22   ;;  %752 = vperm.xlu0 %3778, %v671_v23  }
  0x8d   : > { %761 = vperm.xlu1 %3779, %v674_v24   ;;  %758 = vperm.xlu0 %3778, %v673_v25  }
  0x91   : > { %767 = vperm.xlu1 %3779, %v676_v27   ;;  %764 = vperm.xlu0 %3778, %v675_v28  }
  0x95   : > { %773 = vperm.xlu1 %3779, %v678_v30   ;;  %770 = vperm.xlu0 %3778, %v677_v32  }
  0x98   : > { %v463_v34 = vpop.permute.xlu1 %462  ;;  %v457_v35 = vpop.permute.xlu0 %456 }
  0x99   : > { %vm551_vm0 = vcmp.eq.s32.totalorder %v4112_v33, %v457_v35  ;;  %vm553_vm1 = vcmp.eq.s32.totalorder %v4112_v33, %v463_v34  ;;  %v1699_v35 = vld [vmem:[%s4813_s7] sm:$0xff] }
  0x9a   : > { %3093 = vmatprep.mubr.msk.f32.mxu0 %vm551_vm0, %v3845_v37 }
  0x9c   : > { %v466_v38 = vpop.permute.xlu1 %465  ;;  %v460_v39 = vpop.permute.xlu0 %459 }
  0x9d   : > { %vm552_vm2 = vcmp.eq.s32.totalorder %v4112_v33, %v460_v39  ;;  %vm554_vm3 = vcmp.eq.s32.totalorder %v4112_v33, %v466_v38  ;;  %v1700_v38 = vld [vmem:[%s4813_s7 + $0x8] sm:$0xff] }
  0x9e   : > { %3094 = vmatmul.mubr.msk.f32.vlgmr.msra.gmra.mrb[0].mxu0 %vm552_vm2, %v3845_v37  ;;  %v3575_v39 = vpack.c.bf16 %v1700_v38, %v1699_v35 }
  0x9f   : > { %3546 = vmatpush3.bf16.msra.mxu0 %v3962_v4  ;;  %3096 = vmatprep.mubr.msk.f32.mxu0 %vm553_vm1, %v3845_v37 }
  0xa0   : > { %v472_v40 = vpop.permute.xlu1 %471  ;;  %v469_v41 = vpop.permute.xlu0 %468  ;;  %3548 = vmatprep.subr.bf16.mxu0 %v3967_v6  ;;  %3576 = vmatprep.subr.bf16.mxu1 %v3575_v39 }
  0xa1   : > { %vm555_vm4 = vcmp.eq.s32.totalorder %v4112_v33, %v469_v41  ;;  %vm556_vm5 = vcmp.eq.s32.totalorder %v4112_v33, %v472_v40  ;;  %3578 = vmatpush3.bf16.msra.mxu1 %v3575_v39  ;;  %v1701_v41 = vld [vmem:[%s4813_s7 + $0x10] sm:$0xff] }
  0xa2   : > { %3097 = vmatmul.mubr.msk.f32.gmra.mrb[2].mxu0 %vm554_vm3, %v3845_v37 }
  0xa3   : > { %3099 = vmatprep.mubr.msk.f32.mxu0 %vm555_vm4, %v3845_v37  ;;  %3550 = vmatpush3.bf16.msra.mxu0 %v3967_v6 }
  0xa4   : > { %v478_v42 = vpop.permute.xlu1 %477  ;;  %v475_v43 = vpop.permute.xlu0 %474  ;;  %3552 = vmatprep.subr.bf16.mxu0 %v3986_v9 }
  0xa5   : > { %vm557_vm6 = vcmp.eq.s32.totalorder %v4112_v33, %v475_v43  ;;  %vm558_vm7 = vcmp.eq.s32.totalorder %v4112_v33, %v478_v42  ;;  %v1702_v42 = vld [vmem:[%s4813_s7 + $0x18] sm:$0xff] }
  0xa6   : > { %3100 = vmatmul.mubr.msk.f32.gmra.mrb[4].mxu0 %vm556_vm5, %v3845_v37 }
  0xa7   : > { %3102 = vmatprep.mubr.msk.f32.mxu0 %vm557_vm6, %v3845_v37  ;;  %3554 = vmatpush3.bf16.msra.mxu0 %v3986_v9 }
  0xa8   : > { %v484_v4 = vpop.permute.xlu1 %483  ;;  %v481_v44 = vpop.permute.xlu0 %480  ;;  %3556 = vmatprep.subr.bf16.mxu0 %v4000_v16 }
  0xa9   : > { %vm559_vm8 = vcmp.eq.s32.totalorder %v4112_v33, %v481_v44  ;;  %vm560_vm9 = vcmp.eq.s32.totalorder %v4112_v33, %v484_v4  ;;  %v3579_v4 = vpack.c.bf16 %v1702_v42, %v1701_v41  ;;  %v1321_v44 = vld [vmem:[%s4266_s20] sm:$0xff] }
  0xaa   : > { %3103 = vmatmul.mubr.msk.f32.gmra.mrb[6].mxu0 %vm558_vm7, %v3845_v37 }
  0xab   : > { %3105 = vmatprep.mubr.msk.f32.mxu0 %vm559_vm8, %v3845_v37  ;;  %3558 = vmatpush3.bf16.msra.mxu0 %v4000_v16 }
  0xac   : > { %v490_v6 = vpop.permute.xlu1 %489  ;;  %v487_v45 = vpop.permute.xlu0 %486  ;;  %3560 = vmatprep.subr.bf16.mxu0 %v4012_v21  ;;  %3580 = vmatprep.subr.bf16.mxu1 %v3579_v4 }
  0xad   : > { %vm561_vm10 = vcmp.eq.s32.totalorder %v4112_v33, %v487_v45  ;;  %vm562_vm11 = vcmp.eq.s32.totalorder %v4112_v33, %v490_v6  ;;  %3582 = vmatpush3.bf16.msra.mxu1 %v3579_v4  ;;  %v1703_v6 = vld [vmem:[%s4813_s7 + $0x20] sm:$0xff]  ;;  %v1704_v45 = vld [vmem:[%s4813_s7 + $0x28] sm:$0xff] }
  0xae   : > { %3106 = vmatmul.mubr.msk.f32.gmra.mrb[8].mxu0 %vm560_vm9, %v3845_v37 }
  0xaf   : > { %3108 = vmatprep.mubr.msk.f32.mxu0 %vm561_vm10, %v3845_v37  ;;  %3562 = vmatpush3.bf16.msra.mxu0 %v4012_v21 }
  0xb0   : > { %v496_v9 = vpop.permute.xlu1 %495  ;;  %v493_v46 = vpop.permute.xlu0 %492  ;;  %3564 = vmatprep.subr.bf16.mxu0 %v4024_v26 }
  0xb1   : > { %vm563_vm12 = vcmp.eq.s32.totalorder %v4112_v33, %v493_v46  ;;  %vm564_vm13 = vcmp.eq.s32.totalorder %v4112_v33, %v496_v9  ;;  %v3583_v9 = vpack.c.bf16 %v1704_v45, %v1703_v6  ;;  %v1322_v46 = vld [vmem:[%s4266_s20 + $0x8] sm:$0xff] }
  0xb2   : > { %3109 = vmatmul.mubr.msk.f32.gmra.mrb[10].mxu0 %vm562_vm11, %v3845_v37 }
  0xb3   : > { %3111 = vmatprep.mubr.msk.f32.mxu0 %vm563_vm12, %v3845_v37  ;;  %3566 = vmatpush3.bf16.msra.mxu0 %v4024_v26  ;;  %v1353_v26 = vld [vmem:[%s4810_s4] sm:$0xff] }
  0xb4   : > { %v502_v16 = vpop.permute.xlu1 %501  ;;  %v499_v47 = vpop.permute.xlu0 %498  ;;  %3568 = vmatprep.subr.bf16.mxu0 %v4036_v31  ;;  %3584 = vmatprep.subr.bf16.mxu1 %v3583_v9 }
  0xb5   : > { %vm565_vm14 = vcmp.eq.s32.totalorder %v4112_v33, %v499_v47  ;;  %vm566_vm15 = vcmp.eq.s32.totalorder %v4112_v33, %v502_v16  ;;  %v1323_v16 = vld [vmem:[%s4266_s20 + $0x10] sm:$0xff]  ;;  %3586 = vmatpush3.bf16.msra.mxu1 %v3583_v9  ;;  %v1706_v47 = vld [vmem:[%s4813_s7 + $0x38] sm:$0xff] }
  0xb6   : > { %3112 = vmatmul.mubr.msk.f32.gmra.mrb[12].mxu0 %vm564_vm13, %v3845_v37 }
  0xb7   : > { %3114 = vmatprep.mubr.msk.f32.mxu0 %vm565_vm14, %v3845_v37  ;;  %3570 = vmatpush3.bf16.msra.mxu0 %v4036_v31 }
  0xb8   : > { %v508_v21 = vpop.permute.xlu1 %507  ;;  %v505_v48 = vpop.permute.xlu0 %504  ;;  %3572 = vmatprep.subr.bf16.mxu0 %v4048_v36 }
  0xb9   : > { %vm567_vm0 = vcmp.eq.s32.totalorder %v4112_v33, %v505_v48  ;;  %vm568_vm1 = vcmp.eq.s32.totalorder %v4112_v33, %v508_v21  ;;  %v1324_v21 = vld [vmem:[%s4266_s20 + $0x18] sm:$0xff]  ;;  %v1325_v48 = vld [vmem:[%s4266_s20 + $0x20] sm:$0xff] }
  0xba   : > { %3115 = vmatmul.mubr.msk.f32.gmra.mrb[14].mxu0 %vm566_vm15, %v3845_v37 }
  0xbb   : > { %3117 = vmatprep.mubr.msk.f32.mxu0 %vm567_vm0, %v3845_v37  ;;  %3574 = vmatpush3.bf16.msra.mxu0 %v4048_v36 }
  0xbc   : > { %v514_v49 = vpop.permute.xlu1 %513  ;;  %v511_v31 = vpop.permute.xlu0 %510  ;;  %3221 = vmatprep.subr.mxu0 %v1353_v26 }
  0xbd   : > { %vm569_vm2 = vcmp.eq.s32.totalorder %v4112_v33, %v511_v31  ;;  %vm570_vm3 = vcmp.eq.s32.totalorder %v4112_v33, %v514_v49  ;;  %v1708_v49 = vld [vmem:[%s4813_s7 + $0x48] sm:$0xff] }
  0xbe   : > { %3118 = vmatmul.mubr.msk.f32.gmra.mrb[16].mxu0 %vm568_vm1, %v3845_v37 }
  0xbf   : > { %3120 = vmatprep.mubr.msk.f32.mxu0 %vm569_vm2, %v3845_v37 }
  0xc0   : > { %v520_v50 = vpop.permute.xlu1 %519  ;;  %v517_v51 = vpop.permute.xlu0 %516 }
  0xc1   : > { %vm571_vm4 = vcmp.eq.s32.totalorder %v4112_v33, %v517_v51  ;;  %vm572_vm5 = vcmp.eq.s32.totalorder %v4112_v33, %v520_v50  ;;  %v1326_v50 = vld [vmem:[%s4266_s20 + $0x28] sm:$0xff]  ;;  %v1327_v51 = vld [vmem:[%s4266_s20 + $0x30] sm:$0xff] }
  0xc2   : > { %3121 = vmatmul.mubr.msk.f32.gmra.mrb[18].mxu0 %vm570_vm3, %v3845_v37 }
  0xc3   : > { %3123 = vmatprep.mubr.msk.f32.mxu0 %vm571_vm4, %v3845_v37 }
  0xc4   : > { %v526_v36 = vpop.permute.xlu1 %525  ;;  %v523_v52 = vpop.permute.xlu0 %522 }
  0xc5   : > { %vm573_vm6 = vcmp.eq.s32.totalorder %v4112_v33, %v523_v52  ;;  %vm574_vm7 = vcmp.eq.s32.totalorder %v4112_v33, %v526_v36  ;;  %v1709_v36 = vld [vmem:[%s4813_s7 + $0x50] sm:$0xff]  ;;  %v1710_v52 = vld [vmem:[%s4813_s7 + $0x58] sm:$0xff] }
  0xc6   : > { %3124 = vmatmul.mubr.msk.f32.gmra.mrb[20].mxu0 %vm572_vm5, %v3845_v37 }
  0xc7   : > { %3126 = vmatprep.mubr.msk.f32.mxu0 %vm573_vm6, %v3845_v37 }
  0xc8   : > { %v532_v53 = vpop.permute.xlu1 %531  ;;  %v529_v54 = vpop.permute.xlu0 %528 }
  0xc9   : > { %vm575_vm8 = vcmp.eq.s32.totalorder %v4112_v33, %v529_v54  ;;  %vm576_vm9 = vcmp.eq.s32.totalorder %v4112_v33, %v532_v53  ;;  %v3595_v53 = vpack.c.bf16 %v1710_v52, %v1709_v36  ;;  %v1328_v54 = vld [vmem:[%s4266_s20 + $0x38] sm:$0xff] }
  0xca   : > { %3127 = vmatmul.mubr.msk.f32.gmra.mrb[22].mxu0 %vm574_vm7, %v3845_v37 }
  0xcb   : > { %3129 = vmatprep.mubr.msk.f32.mxu0 %vm575_vm8, %v3845_v37 }
  0xcc   : > { %v538_v55 = vpop.permute.xlu1 %537  ;;  %v535_v56 = vpop.permute.xlu0 %534 }
  0xcd   : > { %vm577_vm10 = vcmp.eq.s32.totalorder %v4112_v33, %v535_v56  ;;  %vm578_vm11 = vcmp.eq.s32.totalorder %v4112_v33, %v538_v55  ;;  %v1329_v55 = vld [vmem:[%s4266_s20 + $0x40] sm:$0xff] }
  0xce   : > { %3130 = vmatmul.mubr.msk.f32.gmra.mrb[24].mxu0 %vm576_vm9, %v3845_v37  ;;  %v1711_v56 = vld [vmem:[%s4813_s7 + $0x60] sm:$0xff] }
  0xcf   : > { %3132 = vmatprep.mubr.msk.f32.mxu0 %vm577_vm10, %v3845_v37 }
  0xd0   : > { %v544_v57 = vpop.permute.xlu1 %543  ;;  %v541_v58 = vpop.permute.xlu0 %540 }
  0xd1   : > { %vm579_vm12 = vcmp.eq.s32.totalorder %v4112_v33, %v541_v58  ;;  %vm580_vm13 = vcmp.eq.s32.totalorder %v4112_v33, %v544_v57  ;;  %v1712_v57 = vld [vmem:[%s4813_s7 + $0x68] sm:$0xff] }
  0xd2   : > { %3133 = vmatmul.mubr.msk.f32.gmra.mrb[26].mxu0 %vm578_vm11, %v3845_v37  ;;  %v3599_v58 = vpack.c.bf16 %v1712_v57, %v1711_v56  ;;  %v1685_v56 = vld [vmem:[%s4812_s6 + $0x10] sm:$0xff]  ;;  %v1686_v57 = vld [vmem:[%s4812_s6 + $0x18] sm:$0xff] }
  0xd3   : > { %3135 = vmatprep.mubr.msk.f32.mxu0 %vm579_vm12, %v3845_v37 }
  0xd4   : > { %v550_v59 = vpop.permute.xlu1 %549  ;;  %v547_v60 = vpop.permute.xlu0 %546 }
  0xd5   : > { %vm581_vm14 = vcmp.eq.s32.totalorder %v4112_v33, %v547_v60  ;;  %vm582_vm15 = vcmp.eq.s32.totalorder %v4112_v33, %v550_v59  ;;  %v1330_v59 = vld [vmem:[%s4266_s20 + $0x48] sm:$0xff]  ;;  %v1331_v60 = vld [vmem:[%s4266_s20 + $0x50] sm:$0xff] }
  0xd6   : > { %3136 = vmatmul.mubr.msk.f32.gmra.mrb[28].mxu0 %vm580_vm13, %v3845_v37 }
  0xd7   : > { %3138 = vmatprep.mubr.msk.f32.mxu0 %vm581_vm14, %v3845_v37 }
  0xd8   : > { %v684_v61 = vpop.permute.xlu1 %683  ;;  %v681_v62 = vpop.permute.xlu0 %680 }
  0xd9   : > { %vm775_vm0 = vcmp.eq.s32.totalorder %v4112_v33, %v681_v62  ;;  %vm776_vm1 = vcmp.eq.s32.totalorder %v4112_v33, %v684_v61  ;;  %v1713_v61 = vld [vmem:[%s4813_s7 + $0x70] sm:$0xff]  ;;  %v1714_v62 = vld [vmem:[%s4813_s7 + $0x78] sm:$0xff] }
  0xda   : > { %3139 = vmatmul.mubr.msk.f32.gmra.mrb[30].mxu0 %vm582_vm15, %v3845_v37 }
  0xdb   : > { %3173 = vmatprep.mubr.msk.f32.mxu0 %vm775_vm0, %v3845_v37 }
  0xdc   : > { %v690_v63 = vpop.permute.xlu1 %689  ;;  %v687_v0 = vpop.permute.xlu0 %686 }
  0xdd   : > { %vm777_vm2 = vcmp.eq.s32.totalorder %v4112_v33, %v687_v0  ;;  %vm778_vm3 = vcmp.eq.s32.totalorder %v4112_v33, %v690_v63  ;;  %v3603_v63 = vpack.c.bf16 %v1714_v62, %v1713_v61  ;;  %v1332_v0 = vld [vmem:[%s4266_s20 + $0x58] sm:$0xff]  ;;  %v1687_v61 = vld [vmem:[%s4812_s6 + $0x20] sm:$0xff]  ;;  %v1688_v62 = vld [vmem:[%s4812_s6 + $0x28] sm:$0xff] }
  0xde   : > { %3174 = vmatmul.mubr.msk.f32.vlgmr.msra.gmra.mrb[32].mxu0 %vm776_vm1, %v3845_v37 }
  0xdf   : > { %3176 = vmatprep.mubr.msk.f32.mxu0 %vm777_vm2, %v3845_v37  ;;  %3222 = vmatpush3.msra.mxu0 %v1353_v26  ;;  %v1707_v26 = vld [vmem:[%s4813_s7 + $0x40] sm:$0xff] }
  0xe0   : > { %v696_v1 = vpop.permute.xlu1 %695  ;;  %v693_v2 = vpop.permute.xlu0 %692  ;;  %v3591_v31 = vpack.c.bf16 %v1708_v49, %v1707_v26 }
  0xe1   : > { %vm779_vm4 = vcmp.eq.s32.totalorder %v4112_v33, %v693_v2  ;;  %vm780_vm5 = vcmp.eq.s32.totalorder %v4112_v33, %v696_v1  ;;  %v1333_v1 = vld [vmem:[%s4266_s20 + $0x60] sm:$0xff]  ;;  %v1334_v2 = vld [vmem:[%s4266_s20 + $0x68] sm:$0xff] }
  0xe2   : > { %3177 = vmatmul.mubr.msk.f32.gmra.mrb[34].mxu0 %vm778_vm3, %v3845_v37 }
  0xe3   : > { %3179 = vmatprep.mubr.msk.f32.mxu0 %vm779_vm4, %v3845_v37 }
  0xe4   : > { %v702_v3 = vpop.permute.xlu1 %701  ;;  %v699_v5 = vpop.permute.xlu0 %698 }
  0xe5   : > { %vm781_vm6 = vcmp.eq.s32.totalorder %v4112_v33, %v699_v5  ;;  %vm782_vm7 = vcmp.eq.s32.totalorder %v4112_v33, %v702_v3  ;;  %v1683_v3 = vld [vmem:[%s4812_s6] sm:$0xff]  ;;  %v1684_v5 = vld [vmem:[%s4812_s6 + $0x8] sm:$0xff] }
  0xe6   : > { %3180 = vmatmul.mubr.msk.f32.gmra.mrb[36].mxu0 %vm780_vm5, %v3845_v37 }
  0xe7   : > { %3182 = vmatprep.mubr.msk.f32.mxu0 %vm781_vm6, %v3845_v37 }
  0xe8   : > { %v708_v7 = vpop.permute.xlu1 %707  ;;  %v705_v8 = vpop.permute.xlu0 %704 }
  0xe9   : > { %vm783_vm8 = vcmp.eq.s32.totalorder %v4112_v33, %v705_v8  ;;  %vm784_vm9 = vcmp.eq.s32.totalorder %v4112_v33, %v708_v7  ;;  %v1335_v7 = vld [vmem:[%s4266_s20 + $0x70] sm:$0xff]  ;;  %v4348_v8 = vpack.c.bf16 %v1684_v5, %v1683_v3  ;;  %v1690_v3 = vld [vmem:[%s4812_s6 + $0x38] sm:$0xff] }
  0xea   : > { %3183 = vmatmul.mubr.msk.f32.gmra.mrb[38].mxu0 %vm782_vm7, %v3845_v37 }
  0xeb   : > { %3185 = vmatprep.mubr.msk.f32.mxu0 %vm783_vm8, %v3845_v37 }
  0xec   : > { %v714_v10 = vpop.permute.xlu1 %713  ;;  %v711_v11 = vpop.permute.xlu0 %710 }
  0xed   : > { %vm785_vm10 = vcmp.eq.s32.totalorder %v4112_v33, %v711_v11  ;;  %vm786_vm11 = vcmp.eq.s32.totalorder %v4112_v33, %v714_v10  ;;  %v1336_v10 = vld [vmem:[%s4266_s20 + $0x78] sm:$0xff]  ;;  %v1337_v11 = vld [vmem:[%s4266_s20 + $0x80] sm:$0xff] }
  0xee   : > { %3186 = vmatmul.mubr.msk.f32.gmra.mrb[40].mxu0 %vm784_vm9, %v3845_v37 }
  0xef   : > { %3188 = vmatprep.mubr.msk.f32.mxu0 %vm785_vm10, %v3845_v37 }
  0xf0   : > { %v720_v12 = vpop.permute.xlu1 %719  ;;  %v717_v13 = vpop.permute.xlu0 %716 }
  0xf1   : > { %vm787_vm12 = vcmp.eq.s32.totalorder %v4112_v33, %v717_v13  ;;  %vm788_vm13 = vcmp.eq.s32.totalorder %v4112_v33, %v720_v12  ;;  %v1338_v12 = vld [vmem:[%s4266_s20 + $0x88] sm:$0xff]  ;;  %v1339_v13 = vld [vmem:[%s4266_s20 + $0x90] sm:$0xff] }
  0xf2   : > { %3189 = vmatmul.mubr.msk.f32.gmra.mrb[42].mxu0 %vm786_vm11, %v3845_v37 }
  0xf3   : > { %3191 = vmatprep.mubr.msk.f32.mxu0 %vm787_vm12, %v3845_v37 }
  0xf4   : > { %v726_v14 = vpop.permute.xlu1 %725  ;;  %v723_v15 = vpop.permute.xlu0 %722 }
  0xf5   : > { %vm789_vm14 = vcmp.eq.s32.totalorder %v4112_v33, %v723_v15  ;;  %vm790_vm15 = vcmp.eq.s32.totalorder %v4112_v33, %v726_v14  ;;  %v1340_v14 = vld [vmem:[%s4266_s20 + $0x98] sm:$0xff]  ;;  %v1341_v15 = vld [vmem:[%s4266_s20 + $0xa0] sm:$0xff] }
  0xf6   : > { %3192 = vmatmul.mubr.msk.f32.gmra.mrb[44].mxu0 %vm788_vm13, %v3845_v37 }
  0xf7   : > { %3194 = vmatprep.mubr.msk.f32.mxu0 %vm789_vm14, %v3845_v37 }
  0xf8   : > { %v732_v17 = vpop.permute.xlu1 %731  ;;  %v729_v18 = vpop.permute.xlu0 %728 }
  0xf9   : > { %vm791_vm0 = vcmp.eq.s32.totalorder %v4112_v33, %v729_v18  ;;  %vm792_vm1 = vcmp.eq.s32.totalorder %v4112_v33, %v732_v17  ;;  %v1342_v17 = vld [vmem:[%s4266_s20 + $0xa8] sm:$0xff]  ;;  %v1343_v18 = vld [vmem:[%s4266_s20 + $0xb0] sm:$0xff] }
  0xfa   : > { %3195 = vmatmul.mubr.msk.f32.gmra.mrb[46].mxu0 %vm790_vm15, %v3845_v37  ;;  %vm1361_vm15 = vcmask 64512  }
  0xfb   : > { %3197 = vmatprep.mubr.msk.f32.mxu0 %vm791_vm0, %v3845_v37 }
  0xfc   : > { %v738_v19 = vpop.permute.xlu1 %737  ;;  %v735_v20 = vpop.permute.xlu0 %734 }
  0xfd   : > { %vm793_vm2 = vcmp.eq.s32.totalorder %v4112_v33, %v735_v20  ;;  %vm794_vm3 = vcmp.eq.s32.totalorder %v4112_v33, %v738_v19  ;;  %v1344_v19 = vld [vmem:[%s4266_s20 + $0xb8] sm:$0xff]  ;;  %v1345_v20 = vld [vmem:[%s4266_s20 + $0xc0] sm:$0xff] }
  0xfe   : > { %3198 = vmatmul.mubr.msk.f32.gmra.mrb[48].mxu0 %vm792_vm1, %v3845_v37 }
  0xff   : > { %3200 = vmatprep.mubr.msk.f32.mxu0 %vm793_vm2, %v3845_v37 }
 0x100   : > { %v744_v22 = vpop.permute.xlu1 %743  ;;  %v741_v23 = vpop.permute.xlu0 %740 }
 0x101   : > { %vm795_vm4 = vcmp.eq.s32.totalorder %v4112_v33, %v741_v23  ;;  %vm796_vm5 = vcmp.eq.s32.totalorder %v4112_v33, %v744_v22  ;;  %v1346_v22 = vld [vmem:[%s4266_s20 + $0xc8] sm:$0xff]  ;;  %v1347_v23 = vld [vmem:[%s4266_s20 + $0xd0] sm:$0xff] }
 0x102   : > { %3201 = vmatmul.mubr.msk.f32.gmra.mrb[50].mxu0 %vm794_vm3, %v3845_v37 }
 0x103   : > { %3203 = vmatprep.mubr.msk.f32.mxu0 %vm795_vm4, %v3845_v37 }
 0x104   : > { %v750_v24 = vpop.permute.xlu1 %749  ;;  %v747_v25 = vpop.permute.xlu0 %746 }
 0x105   : > { %vm797_vm6 = vcmp.eq.s32.totalorder %v4112_v33, %v747_v25  ;;  %vm798_vm7 = vcmp.eq.s32.totalorder %v4112_v33, %v750_v24  ;;  %v1348_v24 = vld [vmem:[%s4266_s20 + $0xd8] sm:$0xff]  ;;  %v1349_v25 = vld [vmem:[%s4266_s20 + $0xe0] sm:$0xff] }
 0x106   : > { %3204 = vmatmul.mubr.msk.f32.gmra.mrb[52].mxu0 %vm796_vm5, %v3845_v37 }
 0x107   : > { %3206 = vmatprep.mubr.msk.f32.mxu0 %vm797_vm6, %v3845_v37 }
 0x108   : > { %v756_v27 = vpop.permute.xlu1 %755  ;;  %v753_v28 = vpop.permute.xlu0 %752 }
 0x109   : > { %vm799_vm8 = vcmp.eq.s32.totalorder %v4112_v33, %v753_v28  ;;  %vm800_vm9 = vcmp.eq.s32.totalorder %v4112_v33, %v756_v27  ;;  %v1350_v27 = vld [vmem:[%s4266_s20 + $0xe8] sm:$0xff]  ;;  %v1351_v28 = vld [vmem:[%s4266_s20 + $0xf0] sm:$0xff] }
 0x10a   : > { %3207 = vmatmul.mubr.msk.f32.gmra.mrb[54].mxu0 %vm798_vm7, %v3845_v37 }
 0x10b   : > { %3209 = vmatprep.mubr.msk.f32.mxu0 %vm799_vm8, %v3845_v37 }
 0x10c   : > { %v762_v29 = vpop.permute.xlu1 %761  ;;  %v759_v30 = vpop.permute.xlu0 %758 }
 0x10d   : > { %vm801_vm10 = vcmp.eq.s32.totalorder %v4112_v33, %v759_v30  ;;  %vm802_vm11 = vcmp.eq.s32.totalorder %v4112_v33, %v762_v29  ;;  %v1352_v29 = vld [vmem:[%s4266_s20 + $0xf8] sm:$0xff]  ;;  %s4690_s20 = scalar_lea.vmem [#allocation2], %s2613_s25  ;;  %s3846_s25 = smov [#allocation2]  }
 0x10e   : > { %3210 = vmatmul.mubr.msk.f32.gmra.mrb[56].mxu0 %vm800_vm9, %v3845_v37  ;;  %s2523_s27 = sshll.u32 %s4690_s20, 4  ;;  %s3784_s21 = sshll.u32 %s3846_s25, 4  ;;  %s4758_s27 = int_to_ptr.vmem [resolvable:$true] %s2523_s27  ;;  %s3785_s21 = int_to_ptr.vmem [resolvable:$false] %s3784_s21 }
 0x10f   : > { %3212 = vmatprep.mubr.msk.f32.mxu0 %vm801_vm10, %v3845_v37  ;;  %s3780_s12 = scalar_lea.vmem %s4758_s27, 4096  ;;  %s3786_s11 = scalar_lea.vmem %s3785_s21, 8192 }
 0x110   : > { %v768_v32 = vpop.permute.xlu1 %767  ;;  %v765_v34 = vpop.permute.xlu0 %764  ;;  %p3781_p11 = scmp.ne.s32.totalorder %s4758_s27, %s3780_s12  ;;  %p3787_p0 = scmp.lt.s32.totalorder %s4758_s27, %s3785_s21 }
 0x111   : > { %vm803_vm12 = vcmp.eq.s32.totalorder %v4112_v33, %v765_v34  ;;  %vm804_vm13 = vcmp.eq.s32.totalorder %v4112_v33, %v768_v32  ;;  %p3788_p1 = scmp.lt.s32.totalorder %s3786_s11, %s3780_s12 }
 0x112   : > { %3213 = vmatmul.mubr.msk.f32.gmra.mrb[58].mxu0 %vm802_vm11, %v3845_v37  ;;  %p3782_p12 = pnand %p3781_p11, %p3942_p5 }
 0x113   : > { %3215 = vmatprep.mubr.msk.f32.mxu0 %vm803_vm12, %v3845_v37  ;;  %p3789_p2 = por %p3788_p1, %p3787_p0 }
 0x114   : > { %v771_v40 = vpop.permute.xlu0 %770  ;;  %v774_v43 = vpop.permute.xlu1 %773  ;;  %p3783_p13 = pneg %p3782_p12 }
 0x115   : > { %vm805_vm14 = vcmp.eq.s32.totalorder %v4112_v33, %v771_v40  ;;  %vm806_vm0 = vcmp.eq.s32.totalorder %v4112_v33, %v774_v43  ;;  %v1705_v33 = vld [vmem:[%s4813_s7 + $0x30] sm:$0xff] }
 0x116   : > { %3216 = vmatmul.mubr.msk.f32.gmra.mrb[60].mxu0 %vm804_vm13, %v3845_v37  ;;  %p3790_p3 = pnand %p3789_p2, %p3783_p13 }
 0x117   : > { %3218 = vmatprep.mubr.msk.f32.mxu0 %vm805_vm14, %v3845_v37 }
 0x11a   : > { %3219 = vmatmul.mubr.msk.f32.gmra.mrb[62].mxu0 %vm806_vm0, %v3845_v37  ;;  %v3587_v37 = vpack.c.bf16 %v1706_v47, %v1705_v33 }
 0x11b   : > { %3223 = vmatprep.mubr.msk.f32.mxu0 %vm1361_vm15, %v1321_v44 }
 0x11c   : > { %3588 = vmatprep.subr.bf16.mxu1 %v3587_v37 }
 0x11d   : > { %3590 = vmatpush3.bf16.msra.mxu1 %v3587_v37 }
 0x11e   : > { %3224 = vmatmul.mubr.msk.f32.vlgmr.msra.gmra.mrb[64].mxu0 %vm1361_vm15, %v1322_v46  ;;  %3592 = vmatprep.subr.bf16.mxu1 %v3591_v31 }
 0x11f   : > { %3226 = vmatprep.mubr.msk.f32.mxu0 %vm1361_vm15, %v1323_v16 }
 0x121   : > { %3594 = vmatpush3.bf16.msra.mxu1 %v3591_v31 }
 0x122   : > { %3227 = vmatmul.mubr.msk.f32.gmra.mrb[66].mxu0 %vm1361_vm15, %v1324_v21  ;;  %3596 = vmatprep.subr.bf16.mxu1 %v3595_v53 }
 0x123   : > { %3229 = vmatprep.mubr.msk.f32.mxu0 %vm1361_vm15, %v1325_v48 }
 0x125   : > { %3598 = vmatpush3.bf16.msra.mxu1 %v3595_v53 }
 0x126   : > { %3230 = vmatmul.mubr.msk.f32.gmra.mrb[68].mxu0 %vm1361_vm15, %v1326_v50  ;;  %3600 = vmatprep.subr.bf16.mxu1 %v3599_v58 }
 0x127   : > { %3232 = vmatprep.mubr.msk.f32.mxu0 %vm1361_vm15, %v1327_v51 }
 0x129   : > { %3602 = vmatpush3.bf16.msra.mxu1 %v3599_v58 }
 0x12a   : > { %3233 = vmatmul.mubr.msk.f32.gmra.mrb[70].mxu0 %vm1361_vm15, %v1328_v54  ;;  %3604 = vmatprep.subr.bf16.mxu1 %v3603_v63 }
 0x12b   : > { %3235 = vmatprep.mubr.msk.f32.mxu0 %vm1361_vm15, %v1329_v55 }
 0x12d   : > { %3606 = vmatpush3.bf16.msra.mxu1 %v3603_v63 }
 0x12e   : > { %3236 = vmatmul.mubr.msk.f32.gmra.mrb[72].mxu0 %vm1361_vm15, %v1330_v59  ;;  %3608 = vmatprep.subr.bf16.mxu1 %v4348_v8 }
 0x12f   : > { %3238 = vmatprep.mubr.msk.f32.mxu0 %vm1361_vm15, %v1331_v60  ;;  %v3611_v60 = vpack.c.bf16 %v1686_v57, %v1685_v56 }
 0x132   : > { %3239 = vmatmul.mubr.msk.f32.gmra.mrb[74].mxu0 %vm1361_vm15, %v1332_v0 }
 0x133   : > { %3241 = vmatprep.mubr.msk.f32.mxu0 %vm1361_vm15, %v1333_v1  ;;  %v3615_v1 = vpack.c.bf16 %v1688_v62, %v1687_v61 }
 0x136   : > { %3242 = vmatmul.mubr.msk.f32.gmra.mrb[76].mxu0 %vm1361_vm15, %v1334_v2  ;;  %v1689_v2 = vld [vmem:[%s4812_s6 + $0x30] sm:$0xff] }
 0x137   : > { %3244 = vmatprep.mubr.msk.f32.mxu0 %vm1361_vm15, %v1335_v7 }
 0x13a   : > { %3245 = vmatmul.mubr.msk.f32.gmra.mrb[78].mxu0 %vm1361_vm15, %v1336_v10  ;;  %v3619_v10 = vpack.c.bf16 %v1690_v3, %v1689_v2 }
 0x13b   : > { %3247 = vmatprep.mubr.msk.f32.mxu0 %vm1361_vm15, %v1337_v11  ;;  %v1692_v11 = vld [vmem:[%s4812_s6 + $0x48] sm:$0xff] }
 0x13e   : > { %3248 = vmatmul.mubr.msk.f32.gmra.mrb[80].mxu0 %vm1361_vm15, %v1338_v12 }
 0x13f   : > { %3250 = vmatprep.mubr.msk.f32.mxu0 %vm1361_vm15, %v1339_v13 }
 0x142   : > { %3251 = vmatmul.mubr.msk.f32.gmra.mrb[82].mxu0 %vm1361_vm15, %v1340_v14 }
 0x143   : > { %3253 = vmatprep.mubr.msk.f32.mxu0 %vm1361_vm15, %v1341_v15  ;;  %v1693_v15 = vld [vmem:[%s4812_s6 + $0x50] sm:$0xff] }
 0x146   : > { %3254 = vmatmul.mubr.msk.f32.gmra.mrb[84].mxu0 %vm1361_vm15, %v1342_v17  ;;  %v1694_v17 = vld [vmem:[%s4812_s6 + $0x58] sm:$0xff] }
 0x147   : > { %3256 = vmatprep.mubr.msk.f32.mxu0 %vm1361_vm15, %v1343_v18 }
 0x14a   : > { %3257 = vmatmul.mubr.msk.f32.gmra.mrb[86].mxu0 %vm1361_vm15, %v1344_v19 }
 0x14b   : > { %3259 = vmatprep.mubr.msk.f32.mxu0 %vm1361_vm15, %v1345_v20  ;;  %v3627_v20 = vpack.c.bf16 %v1694_v17, %v1693_v15 }
 0x14e   : > { %3260 = vmatmul.mubr.msk.f32.gmra.mrb[88].mxu0 %vm1361_vm15, %v1346_v22  ;;  %v1695_v22 = vld [vmem:[%s4812_s6 + $0x60] sm:$0xff] }
 0x14f   : > { %3262 = vmatprep.mubr.msk.f32.mxu0 %vm1361_vm15, %v1347_v23  ;;  %v1696_v23 = vld [vmem:[%s4812_s6 + $0x68] sm:$0xff] }
 0x152   : > { %3263 = vmatmul.mubr.msk.f32.gmra.mrb[90].mxu0 %vm1361_vm15, %v1348_v24 }
 0x153   : > { %3265 = vmatprep.mubr.msk.f32.mxu0 %vm1361_vm15, %v1349_v25 }
 0x156   : > { %3266 = vmatmul.mubr.msk.f32.gmra.mrb[92].mxu0 %vm1361_vm15, %v1350_v27  ;;  %v3631_v27 = vpack.c.bf16 %v1696_v23, %v1695_v22  ;;  %v2168_v22 = vld [vmem:[%s4814_s8 + $0x18] sm:$0xff] }
 0x157   : > { %3268 = vmatprep.mubr.msk.f32.mxu0 %vm1361_vm15, %v1351_v28  ;;  %v1697_v28 = vld [vmem:[%s4812_s6 + $0x70] sm:$0xff] }
 0x15a   : > { %3269 = vmatmul.mubr.msk.f32.gmra.mrb[94].mxu0 %vm1361_vm15, %v1352_v29  ;;  %v1698_v29 = vld [vmem:[%s4812_s6 + $0x78] sm:$0xff] }
 0x171   : > { %v4387_v30 = vpop.f32.mrb[0].mxu0 }
 0x172   : > { %v4389_v32 = vpop.f32.mrb[1].mxu0 }
 0x175   : > { %v4391_v34 = vpop.f32.mrb[2].mxu0 }
 0x176   : > { %v4393_v35 = vpop.f32.mrb[3].mxu0 }
 0x179   : > { %v4395_v38 = vpop.f32.mrb[4].mxu0 }
 0x17a   : > { %v4397_v39 = vpop.f32.mrb[5].mxu0 }
 0x17d   : > { %v4399_v40 = vpop.f32.mrb[6].mxu0 }
 0x17e   : > { %v4401_v41 = vpop.f32.mrb[7].mxu0 }
 0x181   : > { %v4403_v42 = vpop.f32.mrb[8].mxu0 }
 0x182   : > { %v4405_v43 = vpop.f32.mrb[9].mxu0 }
 0x185   : > { %v4407_v4 = vpop.f32.mrb[10].mxu0 }
 0x186   : > { %v4409_v44 = vpop.f32.mrb[11].mxu0 }
 0x189   : > { %v4411_v6 = vpop.f32.mrb[12].mxu0 }
 0x18a   : > { %v4413_v45 = vpop.f32.mrb[13].mxu0 }
 0x18d   : > { %v4415_v9 = vpop.f32.mrb[14].mxu0 }
 0x18e   : > { %v4417_v46 = vpop.f32.mrb[15].mxu0 }
 0x191   : > { %v4419_v16 = vpop.f32.mrb[16].mxu0 }
 0x192   : > { %v4421_v33 = vpop.f32.mrb[17].mxu0 }
 0x195   : > { %v4423_v47 = vpop.f32.mrb[18].mxu0 }
 0x196   : > { %v4425_v37 = vpop.f32.mrb[19].mxu0 }
 0x199   : > { %v4427_v21 = vpop.f32.mrb[20].mxu0 }
 0x19a   : > { %v4429_v48 = vpop.f32.mrb[21].mxu0 }
 0x19d   : > { %v4431_v26 = vpop.f32.mrb[22].mxu0 }
 0x19e   : > { %v4433_v49 = vpop.f32.mrb[23].mxu0 }
 0x1a1   : > { %v4435_v31 = vpop.f32.mrb[24].mxu0 }
 0x1a2   : > { %v4437_v50 = vpop.f32.mrb[25].mxu0 }
 0x1a5   : > { %v4439_v51 = vpop.f32.mrb[26].mxu0 }
 0x1a6   : > { %v4441_v36 = vpop.f32.mrb[27].mxu0 }
 0x1a9   : > { %v4443_v52 = vpop.f32.mrb[28].mxu0 }
 0x1aa   : > { %v4445_v53 = vpop.f32.mrb[29].mxu0 }
 0x1ad   : > { %v4447_v54 = vpop.f32.mrb[30].mxu0 }
 0x1ae   : > { %v4449_v55 = vpop.f32.mrb[31].mxu0 }
 0x1b1   : > { %v3175_v58 = vpop.f32.mrb[32].mxu0 }
 0x1b2   : > { %v1162_v59 = vpop.f32.mrb[33].mxu0 }
 0x1b3   : > { %3303 = vmatprep.mubr.f32.mxu1 %v1162_v59  ;;  %v2165_v59 = vld [vmem:[%s4814_s8] sm:$0xff] }
 0x1b4   : > { %3304 = vmatmul.mubr.f32.vlgmr.msra.gmra.mrb[0].mxu1 %v3175_v58  ;;  %v3635_v58 = vpack.c.bf16 %v1698_v29, %v1697_v28  ;;  %v2170_v28 = vld [vmem:[%s4814_s8 + $0x28] sm:$0xff] }
 0x1b5   : > { %3610 = vmatpush3.bf16.msra.mxu1 %v4348_v8  ;;  %v3178_v63 = vpop.f32.mrb[34].mxu0  ;;  %v1691_v8 = vld [vmem:[%s4812_s6 + $0x40] sm:$0xff] }
 0x1b6   : > { %v1172_v0 = vpop.f32.mrb[35].mxu0  ;;  %3612 = vmatprep.subr.bf16.mxu1 %v3611_v60  ;;  %v3623_v14 = vpack.c.bf16 %v1692_v11, %v1691_v8 }
 0x1b7   : > { %3306 = vmatprep.mubr.f32.mxu1 %v1172_v0 }
 0x1b8   : > { %3307 = vmatmul.mubr.f32.gmra.mrb[2].mxu1 %v3178_v63 }
 0x1b9   : > { %v3181_v5 = vpop.f32.mrb[36].mxu0  ;;  %3614 = vmatpush3.bf16.msra.mxu1 %v3611_v60  ;;  %v2166_v60 = vld [vmem:[%s4814_s8 + $0x8] sm:$0xff] }
 0x1ba   : > { %v1182_v7 = vpop.f32.mrb[37].mxu0  ;;  %3616 = vmatprep.subr.bf16.mxu1 %v3615_v1  ;;  %v3639_v63 = vpack.c.bf16 %v2166_v60, %v2165_v59  ;;  %v2173_v60 = vld [vmem:[%s4814_s8 + $0x40] sm:$0xff] }
 0x1bb   : > { %3309 = vmatprep.mubr.f32.mxu1 %v1182_v7 }
 0x1bc   : > { %3310 = vmatmul.mubr.f32.gmra.mrb[4].mxu1 %v3181_v5 }
 0x1bd   : > { %v3184_v12 = vpop.f32.mrb[38].mxu0  ;;  %3618 = vmatpush3.bf16.msra.mxu1 %v3615_v1 }
 0x1be   : > { %v1192_v13 = vpop.f32.mrb[39].mxu0  ;;  %3620 = vmatprep.subr.bf16.mxu1 %v3619_v10 }
 0x1bf   : > { %3312 = vmatprep.mubr.f32.mxu1 %v1192_v13 }
 0x1c0   : > { %3313 = vmatmul.mubr.f32.gmra.mrb[6].mxu1 %v3184_v12 }
 0x1c1   : > { %v3187_v18 = vpop.f32.mrb[40].mxu0  ;;  %3622 = vmatpush3.bf16.msra.mxu1 %v3619_v10 }
 0x1c2   : > { %v1202_v19 = vpop.f32.mrb[41].mxu0  ;;  %3624 = vmatprep.subr.bf16.mxu1 %v3623_v14 }
 0x1c3   : > { %3315 = vmatprep.mubr.f32.mxu1 %v1202_v19 }
 0x1c4   : > { %3316 = vmatmul.mubr.f32.gmra.mrb[8].mxu1 %v3187_v18 }
 0x1c5   : > { %v3190_v24 = vpop.f32.mrb[42].mxu0  ;;  %3626 = vmatpush3.bf16.msra.mxu1 %v3623_v14 }
 0x1c6   : > { %v1212_v25 = vpop.f32.mrb[43].mxu0  ;;  %3628 = vmatprep.subr.bf16.mxu1 %v3627_v20 }
 0x1c7   : > { %3318 = vmatprep.mubr.f32.mxu1 %v1212_v25 }
 0x1c8   : > { %3319 = vmatmul.mubr.f32.gmra.mrb[10].mxu1 %v3190_v24 }
 0x1c9   : > { %v3193_v56 = vpop.f32.mrb[44].mxu0  ;;  %3630 = vmatpush3.bf16.msra.mxu1 %v3627_v20  ;;  %v2167_v20 = vld [vmem:[%s4814_s8 + $0x10] sm:$0xff] }
 0x1ca   : > { %v1222_v57 = vpop.f32.mrb[45].mxu0  ;;  %3632 = vmatprep.subr.bf16.mxu1 %v3631_v27  ;;  %v3643_v24 = vpack.c.bf16 %v2168_v22, %v2167_v20 }
 0x1cb   : > { %3321 = vmatprep.mubr.f32.mxu1 %v1222_v57  ;;  %v2171_v57 = vld [vmem:[%s4814_s8 + $0x30] sm:$0xff] }
 0x1cc   : > { %3322 = vmatmul.mubr.f32.gmra.mrb[12].mxu1 %v3193_v56 }
 0x1cd   : > { %v3196_v61 = vpop.f32.mrb[46].mxu0  ;;  %3634 = vmatpush3.bf16.msra.mxu1 %v3631_v27  ;;  %v2169_v27 = vld [vmem:[%s4814_s8 + $0x20] sm:$0xff] }
 0x1ce   : > { %v1232_v62 = vpop.f32.mrb[47].mxu0  ;;  %3636 = vmatprep.subr.bf16.mxu1 %v3635_v58 }
 0x1cf   : > { %3324 = vmatprep.mubr.f32.mxu1 %v1232_v62 }
 0x1d0   : > { %3325 = vmatmul.mubr.f32.gmra.mrb[14].mxu1 %v3196_v61  ;;  %v2174_v61 = vld [vmem:[%s4814_s8 + $0x48] sm:$0xff] }
 0x1d1   : > { %v3199_v0 = vpop.f32.mrb[48].mxu0  ;;  %3638 = vmatpush3.bf16.msra.mxu1 %v3635_v58  ;;  %v2172_v58 = vld [vmem:[%s4814_s8 + $0x38] sm:$0xff] }
 0x1d2   : > { %v1242_v1 = vpop.f32.mrb[49].mxu0  ;;  %3640 = vmatprep.subr.bf16.mxu1 %v3639_v63 }
 0x1d3   : > { %3327 = vmatprep.mubr.f32.mxu1 %v1242_v1 }
 0x1d4   : > { %3328 = vmatmul.mubr.f32.gmra.mrb[16].mxu1 %v3199_v0  ;;  %v2176_v0 = vld [vmem:[%s4814_s8 + $0x58] sm:$0xff] }
 0x1d5   : > { %v3202_v2 = vpop.f32.mrb[50].mxu0 }
 0x1d6   : > { %v1252_v3 = vpop.f32.mrb[51].mxu0 }
 0x1d7   : > { %3330 = vmatprep.mubr.f32.mxu1 %v1252_v3  ;;  %v2178_v3 = vld [vmem:[%s4814_s8 + $0x68] sm:$0xff] }
 0x1d8   : > { %3331 = vmatmul.mubr.f32.gmra.mrb[18].mxu1 %v3202_v2  ;;  %v2177_v2 = vld [vmem:[%s4814_s8 + $0x60] sm:$0xff] }
 0x1d9   : > { %v3205_v5 = vpop.f32.mrb[52].mxu0 }
 0x1da   : > { %v1262_v7 = vpop.f32.mrb[53].mxu0 }
 0x1db   : > { %3333 = vmatprep.mubr.f32.mxu1 %v1262_v7  ;;  %v2179_v7 = vld [vmem:[%s4814_s8 + $0x70] sm:$0xff] }
 0x1dc   : > { %3334 = vmatmul.mubr.f32.gmra.mrb[20].mxu1 %v3205_v5 }
 0x1dd   : > { %v3208_v10 = vpop.f32.mrb[54].mxu0 }
 0x1de   : > { %v1272_v8 = vpop.f32.mrb[55].mxu0 }
 0x1df   : > { %3336 = vmatprep.mubr.f32.mxu1 %v1272_v8 }
 0x1e0   : > { %3337 = vmatmul.mubr.f32.gmra.mrb[22].mxu1 %v3208_v10  ;;  %v2180_v10 = vld [vmem:[%s4814_s8 + $0x78] sm:$0xff] }
 0x1e1   : > { %v3211_v11 = vpop.f32.mrb[56].mxu0 }
 0x1e2   : > { %v1282_v12 = vpop.f32.mrb[57].mxu0 }
 0x1e3   : > { %3339 = vmatprep.mubr.f32.mxu1 %v1282_v12 }
 0x1e4   : > { %3340 = vmatmul.mubr.f32.gmra.mrb[24].mxu1 %v3211_v11 }
 0x1e5   : > { %v3214_v13 = vpop.f32.mrb[58].mxu0 }
 0x1e6   : > { %v1292_v14 = vpop.f32.mrb[59].mxu0 }
 0x1e7   : > { %3342 = vmatprep.mubr.f32.mxu1 %v1292_v14 }
 0x1e8   : > { %3343 = vmatmul.mubr.f32.gmra.mrb[26].mxu1 %v3214_v13 }
 0x1e9   : > { %v3217_v15 = vpop.f32.mrb[60].mxu0 }
 0x1ea   : > { %v1302_v17 = vpop.f32.mrb[61].mxu0 }
 0x1eb   : > { %3345 = vmatprep.mubr.f32.mxu1 %v1302_v17 }
 0x1ec   : > { %3346 = vmatmul.mubr.f32.gmra.mrb[28].mxu1 %v3217_v15 }
 0x1ed   : > { %v3220_v18 = vpop.f32.mrb[62].mxu0 }
 0x1ee   : > { %v1312_v19 = vpop.f32.mrb[63].mxu0 }
 0x1ef   : > { %3348 = vmatprep.mubr.f32.mxu1 %v1312_v19 }
 0x1f0   : > { %3349 = vmatmul.mubr.f32.gmra.mrb[30].mxu1 %v3220_v18 }
 0x1f1   : > { %3383 = vmatprep.mubr.f32.mxu1 %v4389_v32  ;;  %v4507_v23 = vpop.f32.mrb[64].mxu0  ;;  %v3647_v32 = vpack.c.bf16 %v2170_v28, %v2169_v27 }
 0x1f2   : > { %v4509_v25 = vpop.f32.mrb[65].mxu0 }
 0x1f4   : > { %3384 = vmatmul.mubr.f32.vlgmr.msra.gmra.mrb[0].mxu1 %v4387_v30 }
 0x1f5   : > { %3642 = vmatpush3.bf16.msra.mxu1 %v3639_v63  ;;  %3386 = vmatprep.mubr.f32.mxu1 %v4393_v35  ;;  %v4519_v29 = vpop.f32.mrb[66].mxu0  ;;  %v3651_v35 = vpack.c.bf16 %v2172_v58, %v2171_v57  ;;  %v2175_v63 = vld [vmem:[%s4814_s8 + $0x50] sm:$0xff] }
 0x1f6   : > { %3644 = vmatprep.subr.bf16.mxu1 %v3643_v24  ;;  %v4521_v56 = vpop.f32.mrb[67].mxu0 }
 0x1f8   : > { %3387 = vmatmul.mubr.f32.gmra.mrb[2].mxu1 %v4391_v34 }
 0x1f9   : > { %3389 = vmatprep.mubr.f32.mxu1 %v4397_v39  ;;  %3646 = vmatpush3.bf16.msra.mxu1 %v3643_v24  ;;  %v4531_v30 = vpop.f32.mrb[68].mxu0  ;;  %v3655_v39 = vpack.c.bf16 %v2174_v61, %v2173_v60 }
 0x1fa   : > { %3648 = vmatprep.subr.bf16.mxu1 %v3647_v32  ;;  %v4533_v59 = vpop.f32.mrb[69].mxu0 }
 0x1fc   : > { %3390 = vmatmul.mubr.f32.gmra.mrb[4].mxu1 %v4395_v38 }
 0x1fd   : > { %3392 = vmatprep.mubr.f32.mxu1 %v4401_v41  ;;  %3650 = vmatpush3.bf16.msra.mxu1 %v3647_v32  ;;  %v4543_v34 = vpop.f32.mrb[70].mxu0  ;;  %v3659_v41 = vpack.c.bf16 %v2176_v0, %v2175_v63 }
 0x1fe   : > { %3652 = vmatprep.subr.bf16.mxu1 %v3651_v35  ;;  %v4545_v62 = vpop.f32.mrb[71].mxu0 }
 0x200   : > { %3393 = vmatmul.mubr.f32.gmra.mrb[6].mxu1 %v4399_v40 }
 0x201   : > { %3395 = vmatprep.mubr.f32.mxu1 %v4405_v43  ;;  %3654 = vmatpush3.bf16.msra.mxu1 %v3651_v35  ;;  %v4555_v38 = vpop.f32.mrb[72].mxu0  ;;  %v3663_v43 = vpack.c.bf16 %v2178_v3, %v2177_v2 }
 0x202   : > { %3656 = vmatprep.subr.bf16.mxu1 %v3655_v39  ;;  %v4557_v1 = vpop.f32.mrb[73].mxu0 }
 0x204   : > { %3396 = vmatmul.mubr.f32.gmra.mrb[8].mxu1 %v4403_v42 }
 0x205   : > { %3398 = vmatprep.mubr.f32.mxu1 %v4409_v44  ;;  %3658 = vmatpush3.bf16.msra.mxu1 %v3655_v39  ;;  %v4567_v40 = vpop.f32.mrb[74].mxu0  ;;  %v3667_v44 = vpack.c.bf16 %v2180_v10, %v2179_v7 }
 0x206   : > { %3660 = vmatprep.subr.bf16.mxu1 %v3659_v41  ;;  %v4569_v5 = vpop.f32.mrb[75].mxu0 }
 0x208   : > { %3399 = vmatmul.mubr.f32.gmra.mrb[10].mxu1 %v4407_v4 }
 0x209   : > { %3401 = vmatprep.mubr.f32.mxu1 %v4413_v45  ;;  %3662 = vmatpush3.bf16.msra.mxu1 %v3659_v41  ;;  %v4579_v42 = vpop.f32.mrb[76].mxu0 }
 0x20a   : > { %3664 = vmatprep.subr.bf16.mxu1 %v3663_v43  ;;  %v4581_v8 = vpop.f32.mrb[77].mxu0 }
 0x20c   : > { %3402 = vmatmul.mubr.f32.gmra.mrb[12].mxu1 %v4411_v6 }
 0x20d   : > { %3404 = vmatprep.mubr.f32.mxu1 %v4417_v46  ;;  %3666 = vmatpush3.bf16.msra.mxu1 %v3663_v43  ;;  %v4585_v11 = vpop.f32.mrb[78].mxu0 }
 0x20e   : > { %3668 = vmatprep.subr.bf16.mxu1 %v3667_v44  ;;  %v1594_v12 = vpop.f32.mrb[79].mxu0 }
 0x210   : > { %3405 = vmatmul.mubr.f32.gmra.mrb[14].mxu1 %v4415_v9 }
 0x211   : > { %3407 = vmatprep.mubr.f32.mxu1 %v4421_v33  ;;  %3670 = vmatpush3.bf16.msra.mxu1 %v3667_v44  ;;  %v4589_v4 = vpop.f32.mrb[80].mxu0 }
 0x212   : > { %v1604_v45 = vpop.f32.mrb[81].mxu0 }
 0x214   : > { %3408 = vmatmul.mubr.f32.gmra.mrb[16].mxu1 %v4419_v16 }
 0x215   : > { %3410 = vmatprep.mubr.f32.mxu1 %v4425_v37  ;;  %v4593_v6 = vpop.f32.mrb[82].mxu0 }
 0x216   : > { %v1614_v46 = vpop.f32.mrb[83].mxu0 }
 0x218   : > { %3411 = vmatmul.mubr.f32.gmra.mrb[18].mxu1 %v4423_v47 }
 0x219   : > { %3413 = vmatprep.mubr.f32.mxu1 %v4429_v48  ;;  %v4597_v13 = vpop.f32.mrb[84].mxu0 }
 0x21a   : > { %v1624_v9 = vpop.f32.mrb[85].mxu0 }
 0x21c   : > { %3414 = vmatmul.mubr.f32.gmra.mrb[20].mxu1 %v4427_v21 }
 0x21d   : > { %3416 = vmatprep.mubr.f32.mxu1 %v4433_v49  ;;  %v4601_v33 = vpop.f32.mrb[86].mxu0 }
 0x21e   : > { %v1634_v14 = vpop.f32.mrb[87].mxu0 }
 0x220   : > { %3417 = vmatmul.mubr.f32.gmra.mrb[22].mxu1 %v4431_v26  ;;  %v4618_v26 = vld [vmem:[%s4811_s5] ss:$0 sm:$0xff] }
 0x221   : > { %3419 = vmatprep.mubr.f32.mxu1 %v4437_v50  ;;  %v4605_v16 = vpop.f32.mrb[88].mxu0  ;;  %v1550_v15 = vadd.f32 %v4531_v30, %v4618_v26  ;;  %v1565_v17 = vadd.f32 %v4618_v26, %v4557_v1  ;;  %v1560_v18 = vadd.f32 %v4543_v34, %v4618_v26  ;;  %v1575_v19 = vadd.f32 %v4618_v26, %v4569_v5 }
 0x222   : > { %v1644_v37 = vpop.f32.mrb[89].mxu0  ;;  %v1570_v20 = vadd.f32 %v4555_v38, %v4618_v26  ;;  %v1585_v22 = vadd.f32 %v4618_v26, %v4581_v8  ;;  %v1595_v24 = vadd.f32 %v4618_v26, %v1594_v12  ;;  %v1605_v27 = vadd.f32 %v4618_v26, %v1604_v45  ;;  %v4686_v38 = vld [vmem:[%s4815_s9] ss:$0 sm:$0xff] }
 0x223   : > { %v1600_v28 = vadd.f32 %v4585_v11, %v4618_v26  ;;  %v1610_v32 = vadd.f32 %v4589_v4, %v4618_v26  ;;  %v1620_v57 = vadd.f32 %v4593_v6, %v4618_v26  ;;  %v1635_v58 = vadd.f32 %v4618_v26, %v1634_v14 }
 0x224   : > { %3420 = vmatmul.mubr.f32.gmra.mrb[24].mxu1 %v4435_v31  ;;  %v1525_v31 = vadd.f32 %v4618_v26, %v4509_v25  ;;  %v1590_v25 = vadd.f32 %v4579_v42, %v4618_v26  ;;  %v1630_v30 = vadd.f32 %v4597_v13, %v4618_v26  ;;  %v1645_v35 = vadd.f32 %v4618_v26, %v1644_v37 }
 0x225   : > { %3422 = vmatprep.mubr.f32.mxu1 %v4441_v36  ;;  %v4609_v47 = vpop.f32.mrb[90].mxu0  ;;  %v1535_v36 = vadd.f32 %v4618_v26, %v4521_v56  ;;  %v1625_v56 = vadd.f32 %v4618_v26, %v1624_v9  ;;  %v1650_v61 = vadd.f32 %v4605_v16, %v4618_v26 }
 0x226   : > { %v1654_v48 = vpop.f32.mrb[91].mxu0  ;;  %v1660_v39 = vadd.f32 %v4609_v47, %v4618_v26 }
 0x227   : > { %v1655_v60 = vadd.f32 %v4618_v26, %v1654_v48 }
 0x228   : > { %3423 = vmatmul.mubr.f32.gmra.mrb[26].mxu1 %v4439_v51 }
 0x229   : > { %3425 = vmatprep.mubr.f32.mxu1 %v4445_v53  ;;  %v4613_v21 = vpop.f32.mrb[92].mxu0  ;;  %v1530_v53 = vadd.f32 %v4507_v23, %v4618_v26  ;;  %v1580_v23 = vadd.f32 %v4567_v40, %v4618_v26 }
 0x22a   : > { %v1664_v49 = vpop.f32.mrb[93].mxu0  ;;  %v1670_v63 = vadd.f32 %v4613_v21, %v4618_v26 }
 0x22b   : > { %v1665_v34 = vadd.f32 %v4618_v26, %v1664_v49 }
 0x22c   : > { %3426 = vmatmul.mubr.f32.gmra.mrb[28].mxu1 %v4443_v52  ;;  %v1545_v52 = vadd.f32 %v4618_v26, %v4533_v59  ;;  %v1640_v59 = vadd.f32 %v4601_v33, %v4618_v26 }
 0x22d   : > { %3428 = vmatprep.mubr.f32.mxu1 %v4449_v55  ;;  %v4624_v50 = vpop.f32.mrb[94].mxu0  ;;  %v1540_v55 = vadd.f32 %v4519_v29, %v4618_v26  ;;  %v1615_v29 = vadd.f32 %v4618_v26, %v1614_v46 }
 0x22e   : > { %v1674_v51 = vpop.f32.mrb[95].mxu0  ;;  %v1680_v0 = vadd.f32 %v4624_v50, %v4618_v26 }
 0x230   : > { %3429 = vmatmul.mubr.f32.gmra.mrb[30].mxu1 %v4447_v54  ;;  %v1555_v54 = vadd.f32 %v4618_v26, %v4545_v62  ;;  %v1675_v62 = vadd.f32 %v4618_v26, %v1674_v51 }
 0x231   : > { %3463 = vmatprep.mubr.f32.mxu1 %v1525_v31 }
 0x234   : > { %3464 = vmatmul.mubr.f32.vlgmr.msra.gmra.mrb[0].mxu1 %v1530_v53 }
 0x235   : > { %3466 = vmatprep.mubr.f32.mxu1 %v1535_v36 }
 0x238   : > { %3467 = vmatmul.mubr.f32.gmra.mrb[2].mxu1 %v1540_v55 }
 0x239   : > { %3469 = vmatprep.mubr.f32.mxu1 %v1545_v52 }
 0x23c   : > { %3470 = vmatmul.mubr.f32.gmra.mrb[4].mxu1 %v1550_v15 }
 0x23d   : > { %3472 = vmatprep.mubr.f32.mxu1 %v1555_v54 }
 0x240   : > { %3473 = vmatmul.mubr.f32.gmra.mrb[6].mxu1 %v1560_v18 }
 0x241   : > { %3475 = vmatprep.mubr.f32.mxu1 %v1565_v17 }
 0x244   : > { %3476 = vmatmul.mubr.f32.gmra.mrb[8].mxu1 %v1570_v20 }
 0x245   : > { %3478 = vmatprep.mubr.f32.mxu1 %v1575_v19 }
 0x248   : > { %3479 = vmatmul.mubr.f32.gmra.mrb[10].mxu1 %v1580_v23 }
 0x249   : > { %3481 = vmatprep.mubr.f32.mxu1 %v1585_v22 }
 0x24c   : > { %3482 = vmatmul.mubr.f32.gmra.mrb[12].mxu1 %v1590_v25 }
 0x24d   : > { %3484 = vmatprep.mubr.f32.mxu1 %v1595_v24 }
 0x250   : > { %3485 = vmatmul.mubr.f32.gmra.mrb[14].mxu1 %v1600_v28 }
 0x251   : > { %3487 = vmatprep.mubr.f32.mxu1 %v1605_v27 }
 0x254   : > { %3488 = vmatmul.mubr.f32.gmra.mrb[16].mxu1 %v1610_v32 }
 0x255   : > { %3490 = vmatprep.mubr.f32.mxu1 %v1615_v29 }
 0x258   : > { %3491 = vmatmul.mubr.f32.gmra.mrb[18].mxu1 %v1620_v57 }
 0x259   : > { %3493 = vmatprep.mubr.f32.mxu1 %v1625_v56 }
 0x25c   : > { %3494 = vmatmul.mubr.f32.gmra.mrb[20].mxu1 %v1630_v30 }
 0x25d   : > { %3496 = vmatprep.mubr.f32.mxu1 %v1635_v58 }
 0x260   : > { %3497 = vmatmul.mubr.f32.gmra.mrb[22].mxu1 %v1640_v59 }
 0x261   : > { %3499 = vmatprep.mubr.f32.mxu1 %v1645_v35 }
 0x264   : > { %3500 = vmatmul.mubr.f32.gmra.mrb[24].mxu1 %v1650_v61 }
 0x265   : > { %3502 = vmatprep.mubr.f32.mxu1 %v1655_v60 }
 0x268   : > { %3503 = vmatmul.mubr.f32.gmra.mrb[26].mxu1 %v1660_v39 }
 0x269   : > { %3505 = vmatprep.mubr.f32.mxu1 %v1665_v34 }
 0x26c   : > { %3506 = vmatmul.mubr.f32.gmra.mrb[28].mxu1 %v1670_v63 }
 0x26d   : > { %3508 = vmatprep.mubr.f32.mxu1 %v1675_v62 }
 0x270   : > { %3509 = vmatmul.mubr.f32.gmra.mrb[30].mxu1 %v1680_v0 }
 0x307   : > { %v3465_v41 = vpop.f32.mrb[0].mxu1 }
 0x308   : > { %v2446_v1 = vadd.f32 %v3465_v41, %v4686_v38  ;;  %v2247_v2 = vpop.f32.mrb[1].mxu1 }
 0x309   : > { %v2445_v3 = vadd.f32 %v4686_v38, %v2247_v2 }
 0x30a   : > { %2478 = vst [vmem:[%s4690_s20 + $0x8] sm:$0xff] %v2446_v1 }
 0x30b   : > { %2477 = vst [vmem:[%s4690_s20] sm:$0xff] %v2445_v3  ;;  %v3468_v40 = vpop.f32.mrb[2].mxu1 }
 0x30c   : > { %v2448_v43 = vadd.f32 %v3468_v40, %v4686_v38  ;;  %v2257_v5 = vpop.f32.mrb[3].mxu1 }
 0x30d   : > { %v2447_v7 = vadd.f32 %v4686_v38, %v2257_v5 }
 0x30e   : > { %2480 = vst [vmem:[%s4690_s20 + $0x18] sm:$0xff] %v2448_v43 }
 0x30f   : > { %2479 = vst [vmem:[%s4690_s20 + $0x10] sm:$0xff] %v2447_v7  ;;  %v3471_v10 = vpop.f32.mrb[4].mxu1 }
 0x310   : > { %v2450_v42 = vadd.f32 %v3471_v10, %v4686_v38  ;;  %v2267_v44 = vpop.f32.mrb[5].mxu1 }
 0x311   : > { %v2449_v8 = vadd.f32 %v4686_v38, %v2267_v44 }
 0x312   : > { %2482 = vst [vmem:[%s4690_s20 + $0x28] sm:$0xff] %v2450_v42 }
 0x313   : > { %2481 = vst [vmem:[%s4690_s20 + $0x20] sm:$0xff] %v2449_v8  ;;  %v3474_v11 = vpop.f32.mrb[6].mxu1 }
 0x314   : > { %v2452_v12 = vadd.f32 %v3474_v11, %v4686_v38  ;;  %v2277_v4 = vpop.f32.mrb[7].mxu1 }
 0x315   : > { %v2451_v45 = vadd.f32 %v4686_v38, %v2277_v4 }
 0x316   : > { %2484 = vst [vmem:[%s4690_s20 + $0x38] sm:$0xff] %v2452_v12 }
 0x317   : > { %2483 = vst [vmem:[%s4690_s20 + $0x30] sm:$0xff] %v2451_v45  ;;  %v3477_v6 = vpop.f32.mrb[8].mxu1 }
 0x318   : > { %v2454_v46 = vadd.f32 %v3477_v6, %v4686_v38  ;;  %v2287_v13 = vpop.f32.mrb[9].mxu1 }
 0x319   : > { %v2453_v9 = vadd.f32 %v4686_v38, %v2287_v13 }
 0x31a   : > { %2486 = vst [vmem:[%s4690_s20 + $0x48] sm:$0xff] %v2454_v46 }
 0x31b   : > { %2485 = vst [vmem:[%s4690_s20 + $0x40] sm:$0xff] %v2453_v9  ;;  %v3480_v33 = vpop.f32.mrb[10].mxu1 }
 0x31c   : > { %v2456_v14 = vadd.f32 %v3480_v33, %v4686_v38  ;;  %v2297_v16 = vpop.f32.mrb[11].mxu1 }
 0x31d   : > { %v2455_v37 = vadd.f32 %v4686_v38, %v2297_v16 }
 0x31e   : > { %2488 = vst [vmem:[%s4690_s20 + $0x58] sm:$0xff] %v2456_v14 }
 0x31f   : > { %2487 = vst [vmem:[%s4690_s20 + $0x50] sm:$0xff] %v2455_v37  ;;  %v3483_v47 = vpop.f32.mrb[12].mxu1 }
 0x320   : > { %v2458_v48 = vadd.f32 %v3483_v47, %v4686_v38  ;;  %v2307_v21 = vpop.f32.mrb[13].mxu1 }
 0x321   : > { %v2457_v26 = vadd.f32 %v4686_v38, %v2307_v21 }
 0x322   : > { %2490 = vst [vmem:[%s4690_s20 + $0x68] sm:$0xff] %v2458_v48 }
 0x323   : > { %2489 = vst [vmem:[%s4690_s20 + $0x60] sm:$0xff] %v2457_v26  ;;  %v3486_v49 = vpop.f32.mrb[14].mxu1 }
 0x324   : > { %v2460_v31 = vadd.f32 %v3486_v49, %v4686_v38  ;;  %v2317_v50 = vpop.f32.mrb[15].mxu1 }
 0x325   : > { %v2459_v51 = vadd.f32 %v4686_v38, %v2317_v50 }
 0x326   : > { %2492 = vst [vmem:[%s4690_s20 + $0x78] sm:$0xff] %v2460_v31 }
 0x327   : > { %2491 = vst [vmem:[%s4690_s20 + $0x70] sm:$0xff] %v2459_v51  ;;  %v3489_v36 = vpop.f32.mrb[16].mxu1 }
 0x328   : > { %v2462_v53 = vadd.f32 %v3489_v36, %v4686_v38  ;;  %v2327_v52 = vpop.f32.mrb[17].mxu1 }
 0x329   : > { %v2461_v55 = vadd.f32 %v4686_v38, %v2327_v52 }
 0x32a   : > { %2494 = vst [vmem:[%s4690_s20 + $0x88] sm:$0xff] %v2462_v53 }
 0x32b   : > { %2493 = vst [vmem:[%s4690_s20 + $0x80] sm:$0xff] %v2461_v55  ;;  %v3492_v54 = vpop.f32.mrb[18].mxu1 }
 0x32c   : > { %v2464_v15 = vadd.f32 %v3492_v54, %v4686_v38  ;;  %v2337_v17 = vpop.f32.mrb[19].mxu1 }
 0x32d   : > { %v2463_v18 = vadd.f32 %v4686_v38, %v2337_v17 }
 0x32e   : > { %2496 = vst [vmem:[%s4690_s20 + $0x98] sm:$0xff] %v2464_v15 }
 0x32f   : > { %2495 = vst [vmem:[%s4690_s20 + $0x90] sm:$0xff] %v2463_v18  ;;  %v3495_v19 = vpop.f32.mrb[20].mxu1 }
 0x330   : > { %v2466_v20 = vadd.f32 %v3495_v19, %v4686_v38  ;;  %v2347_v22 = vpop.f32.mrb[21].mxu1 }
 0x331   : > { %v2465_v23 = vadd.f32 %v4686_v38, %v2347_v22 }
 0x332   : > { %2498 = vst [vmem:[%s4690_s20 + $0xa8] sm:$0xff] %v2466_v20 }
 0x333   : > { %2497 = vst [vmem:[%s4690_s20 + $0xa0] sm:$0xff] %v2465_v23  ;;  %v3498_v24 = vpop.f32.mrb[22].mxu1 }
 0x334   : > { %v2468_v25 = vadd.f32 %v3498_v24, %v4686_v38  ;;  %v2357_v27 = vpop.f32.mrb[23].mxu1 }
 0x335   : > { %v2467_v28 = vadd.f32 %v4686_v38, %v2357_v27 }
 0x336   : > { %2500 = vst [vmem:[%s4690_s20 + $0xb8] sm:$0xff] %v2468_v25 }
 0x337   : > { %2499 = vst [vmem:[%s4690_s20 + $0xb0] sm:$0xff] %v2467_v28  ;;  %v3501_v29 = vpop.f32.mrb[24].mxu1 }
 0x338   : > { %v2470_v32 = vadd.f32 %v3501_v29, %v4686_v38  ;;  %v2367_v56 = vpop.f32.mrb[25].mxu1 }
 0x339   : > { %v2469_v57 = vadd.f32 %v4686_v38, %v2367_v56 }
 0x33a   : > { %2502 = vst [vmem:[%s4690_s20 + $0xc8] sm:$0xff] %v2470_v32 }
 0x33b   : > { %2501 = vst [vmem:[%s4690_s20 + $0xc0] sm:$0xff] %v2469_v57  ;;  %v3504_v58 = vpop.f32.mrb[26].mxu1 }
 0x33c   : > { %v2472_v30 = vadd.f32 %v3504_v58, %v4686_v38  ;;  %v2377_v35 = vpop.f32.mrb[27].mxu1 }
 0x33d   : > { %v2471_v59 = vadd.f32 %v4686_v38, %v2377_v35 }
 0x33e   : > { %2504 = vst [vmem:[%s4690_s20 + $0xd8] sm:$0xff] %v2472_v30 }
 0x33f   : > { %2503 = vst [vmem:[%s4690_s20 + $0xd0] sm:$0xff] %v2471_v59  ;;  %v3507_v60 = vpop.f32.mrb[28].mxu1 }
 0x340   : > { %v2474_v61 = vadd.f32 %v3507_v60, %v4686_v38  ;;  %v2387_v34 = vpop.f32.mrb[29].mxu1 }
 0x341   : > { %v2473_v39 = vadd.f32 %v4686_v38, %v2387_v34 }
 0x342   : > { %2506 = vst [vmem:[%s4690_s20 + $0xe8] sm:$0xff] %v2474_v61 }
 0x343   : > { %2505 = vst [vmem:[%s4690_s20 + $0xe0] sm:$0xff] %v2473_v39  ;;  %v3510_v62 = vpop.f32.mrb[30].mxu1 }
 0x344   : > { %v2476_v63 = vadd.f32 %v3510_v62, %v4686_v38  ;;  %v2397_v0 = vpop.f32.mrb[31].mxu1 }
 0x345   : > { %v2475_v41 = vadd.f32 %v4686_v38, %v2397_v0 }
 0x346   : > { %2508 = vst [vmem:[%s4690_s20 + $0xf8] sm:$0xff] %v2476_v63 }
 0x347   : > { %2507 = vst [vmem:[%s4690_s20 + $0xf0] sm:$0xff] %v2475_v41 }
 0x348   : > { %3793 = shalt.err (!%p3790_p3)
}
 0x349   : > { %s3794_s18 = scalar_lea.hbm %s4756_s30, 4096  ;;  %s3798_s28 = scalar_lea.hbm %s4816_s10, 8192 }
 0x34a   : > { %p3795_p4 = scmp.ne.s32.totalorder %s4756_s30, %s3794_s18  ;;  %p3799_p9 = scmp.lt.u32.totalorder %s4756_s30, %s4816_s10 }
 0x34b   : > { %p3800_p10 = scmp.lt.u32.totalorder %s3798_s28, %s3794_s18  ;;  %p3802_p12 = scmp.lt.u32.totalorder %s3794_s18, %s4756_s30 }
 0x34c   : > { %p3796_p7 = pnand %p3795_p4, %p3942_p5 }
 0x34d   : > { %p3801_p11 = por %p3800_p10, %p3799_p9 }
 0x34e   : > { %p3797_p8 = pneg %p3796_p7 }
 0x34f   : > { %p3803_p13 = por %p3802_p12, %p3801_p11 }
 0x351   : > { %p3804_p0 = pnand %p3803_p13, %p3797_p8 }
 0x353   : > { %3807 = shalt.err (!%p3804_p0)
}
 0x354   : > { %s3847_s12 = smov 128   ;;  %s3848_s21 = smov 8  }
 0x355   : > { %3735 = dma.vmem_to_hbm [thread:$0]  (%p3942_p5), %s4758_s27, 4096, %s4756_s30, %s4765_s17, %s3847_s12, %s3847_s12, %s3848_s21  }
 0x356 PF: > { %p3741_p1 = scmp.ge.s32.totalorder %s3842_s16, 2  ;;  %s2538_s11 = sand.u32 1, %s3830_s13  }
 0x357   : > { %s2539_s18 = scalar_lea.sflag [#allocation3], %s2538_s11 }
 0x358   : > { %p3738_p2 = pnand %p3741_p1, %p3946_p6 }
 0x35a   : > { %3825 = dma.done.wait (!%p3738_p2), %s2539_s18, 4096  }
 0x35b   : > { %3827 = vsyncadd (!%p3738_p2), %s2539_s18, 4294963200  ;;  %p20_p3 = scmp.ge.s32.totalorder %s3929_s19, 4   ;;  %s4819_s13 = smov %s3834_s14 }
 0x35c   : > { %s4820_s14 = smov %s3838_s15  ;;  %s4821_s15 = smov %s3940_s22 }
 0x35d   : > { %s4822_s16 = smov %s3929_s19  ;;  %22 = sbr.rel (!%p20_p3) target bundleno = 3 (0x3), region = 101 }
 0x364   :  { %2544 = vsyncpa [#allocation3], 1 }
 0x365   :  { %2546 = vsyncpa [#allocation3 + $0x1], 1 }

</bundles_post_ra>
